<compile_context>
chip_gen: v7x
topology: tpu7x:2x2x1
jax: 0.10.0
libtpu: 0.0.40
codegen_flags: <defaults>
</compile_context>

<pallas_src>
import jax
import jax.numpy as jnp
from jax.experimental import pallas as pl
from jax.experimental.pallas import tpu as pltpu


LANE = 128


def _round_up(v, m):
    return ((v + m - 1) // m) * m


def critic_kernel(x_ref, u_ref,
                  w1_ref, b1_ref,
                  w2x_ref, w2u_ref, b2_ref,
                  w3f_ref, b3f_ref,
                  out_ref):
    # layer 1: bf16 MXU operands, f32 accumulate; bias + ReLU epilogue in bf16
    # (bf16-rounding commutes with ReLU, and the next MXU input is bf16 anyway).
    h1 = jnp.dot(x_ref[...].astype(jnp.bfloat16), w1_ref[...],
                 preferred_element_type=jnp.float32)
    h1 = jnp.maximum((h1 + b1_ref[...]).astype(jnp.bfloat16), 0)

    # layer 2 on cat([h1, u], 1)  ==  h1 @ W2x + u @ W2u, then ReLU (f32 epilogue).
    h2 = (jnp.dot(h1, w2x_ref[...], preferred_element_type=jnp.float32)
          + jnp.dot(u_ref[...].astype(jnp.bfloat16), w2u_ref[...],
                    preferred_element_type=jnp.float32)
          + b2_ref[...])
    h2 = jnp.maximum(h2, 0.0)

    # Folded l3_additional + l3: q = h2 @ (W3a @ w3) + (b3a @ w3 + b3).
    # VPU multiply + lane reduce; the folded bias is an SMEM scalar.
    q = jnp.sum(h2 * w3f_ref[...], axis=-1, keepdims=True) + b3f_ref[0, 0]

    # (TB, 1) output block — tiny HBM writeback, no broadcast slab.
    out_ref[...] = q.astype(out_ref.dtype)


def critic_net_forward(x, u, params, *, batch_tile=512):
    assert batch_tile % LANE == 0
    B, SD = x.shape
    _, AD = u.shape
    assert params["w1"].shape[0] == SD and params["w2u"].shape[0] == AD
    H1 = params["w1"].shape[1]
    H2 = params["w2x"].shape[1]

    # Adaptive batch tile: shrink for small batches; if a single tile would
    # cover everything, split it so both v7x TensorCores get a grid step.
    TB = min(batch_tile, _round_up(B, LANE))
    if _round_up(B, TB) // TB < 2 and TB >= 2 * LANE:
        TB //= 2
    B_pad = _round_up(B, TB)

    # Only the batch dim is padded; feature dims stay at their natural widths.
    xp = jnp.pad(x, ((0, B_pad - B), (0, 0))) if B_pad != B else x
    up = jnp.pad(u, ((0, B_pad - B), (0, 0))) if B_pad != B else u

    def pinned(shape):
        # Constant index_map -> weights/biases resident in VMEM across grid steps.
        return pl.BlockSpec(shape, lambda i: (0, 0))

    out = pl.pallas_call(
        critic_kernel,
        out_shape=jax.ShapeDtypeStruct((B_pad, 1), jnp.float32),
        grid=(B_pad // TB,),
        in_specs=[
            pl.BlockSpec((TB, SD), lambda i: (i, 0)),          # x tile
            pl.BlockSpec((TB, AD), lambda i: (i, 0)),          # u tile
            pinned((SD, H1)),                                  # w1      (bf16)
            pinned((1, H1)),                                   # b1      (f32)
            pinned((H1, H2)),                                  # w2x     (bf16)
            pinned((AD, H2)),                                  # w2u     (bf16)
            pinned((1, H2)),                                   # b2      (f32)
            pinned((1, H2)),                                   # folded w3 row (f32)
            pl.BlockSpec(memory_space=pltpu.MemorySpace.SMEM), # folded b3 scalar
        ],
        out_specs=pl.BlockSpec((TB, 1), lambda i: (i, 0)),
        compiler_params=pltpu.CompilerParams(
            dimension_semantics=("parallel",)),
    )(xp, up,
      params["w1"], params["b1"],
      params["w2x"], params["w2u"], params["b2"],
      params["w3f_row"], params["b3f"])

    return out[:B]


def init_params(key, state_dim, action_dim):
    """PyTorch nn.Linear default init (uniform +/- 1/sqrt(fan_in)) on the true
    dims. Hidden dims zero-padded to lane multiples (400->512, 300->384); input
    feature dims kept natural. Matmul weights in bf16; biases / folded final
    row in f32. l3_additional and l3 are folded exactly (no activation between)."""
    H1_RAW, H2_RAW = 400, 300
    H1 = _round_up(H1_RAW, LANE)   # 512
    H2 = _round_up(H2_RAW, LANE)   # 384

    def linear(k, fan_in, fan_out):
        kw, kb = jax.random.split(k)
        bound = float(fan_in) ** -0.5
        w = jax.random.uniform(kw, (fan_in, fan_out), jnp.float32, -bound, bound)
        b = jax.random.uniform(kb, (1, fan_out), jnp.float32, -bound, bound)
        return w, b

    def pad2(a, rows, cols):
        return jnp.pad(a, ((0, rows - a.shape[0]), (0, cols - a.shape[1])))

    def pad_cols(a, cols):
        return jnp.pad(a, ((0, 0), (0, cols - a.shape[1])))

    k1, k2, k3, k4 = jax.random.split(key, 4)
    w1, b1 = linear(k1, state_dim, H1_RAW)
    w2, b2 = linear(k2, H1_RAW + action_dim, H2_RAW)   # l2 sees cat([h1, u], 1)
    w2x, w2u = w2[:H1_RAW], w2[H1_RAW:]
    w3a, b3a = linear(k3, H2_RAW, H2_RAW)
    w3, b3 = linear(k4, H2_RAW, 1)

    # Exact fold of l3_additional followed by l3 (no activation between them).
    w3f = w3a @ w3                                      # (300, 1)
    b3f = (b3a @ w3)[0, 0] + b3[0, 0]                   # scalar

    return {
        "w1":      pad_cols(w1, H1).astype(jnp.bfloat16),   # (state_dim, 512)
        "b1":      pad_cols(b1, H1),                        # (1, 512)  f32, zero-padded
        "w2x":     pad2(w2x, H1, H2).astype(jnp.bfloat16),  # (512, 384)
        "w2u":     pad_cols(w2u, H2).astype(jnp.bfloat16),  # (action_dim, 384)
        "b2":      pad_cols(b2, H2),                        # (1, 384)  f32, zero-padded
        "w3f_row": pad_cols(w3f.T, H2),                     # (1, 384)  f32, zero-padded
        "b3f":     jnp.full((1, 1), b3f, jnp.float32),      # SMEM scalar
    }


def reference_forward(x, u, p):
    """Pure-JAX reference using the same bf16-rounded operands / f32 accumulate."""
    hi = jax.lax.Precision.HIGHEST
    f32 = lambda a: a.astype(jnp.float32)
    bf = lambda a: a.astype(jnp.bfloat16).astype(jnp.float32)
    h1 = jax.nn.relu(jnp.dot(bf(x), f32(p["w1"]), precision=hi) + p["b1"])
    h2 = jax.nn.relu(jnp.dot(bf(h1), f32(p["w2x"]), precision=hi)
                     + jnp.dot(bf(u), f32(p["w2u"]), precision=hi)
                     + p["b2"])
    return jnp.sum(h2 * p["w3f_row"], axis=-1, keepdims=True) + p["b3f"][0, 0]


if __name__ == "__main__":
    key = jax.random.PRNGKey(0)
    k_x, k_u, k_p = jax.random.split(key, 3)

    B, state_dim, z_dim = 8, 32, 8          # small shapes consistent with the module
    x = jax.random.normal(k_x, (B, state_dim), jnp.float32)
    u = jax.random.normal(k_u, (B, z_dim), jnp.float32)
    params = init_params(k_p, state_dim, z_dim)

    out = critic_net_forward(x, u, params)
    out = jax.block_until_ready(out)

    ref = reference_forward(x, u, params)
    assert out.shape == (B, 1)
    assert jnp.allclose(out, ref, atol=1e-2, rtol=1e-2)

    print("KERNEL_OK")
</pallas_src>

<mosaic_0001>
module attributes {stable_mosaic.version = 11 : i64} {
  func.func @critic_kernel(%arg0: i32, %arg1: memref<128x32xf32, #tpu.memory_space<vmem>>, %arg2: memref<128x8xf32, #tpu.memory_space<vmem>>, %arg3: memref<32x512xbf16, #tpu.memory_space<vmem>>, %arg4: memref<1x512xf32, #tpu.memory_space<vmem>>, %arg5: memref<512x384xbf16, #tpu.memory_space<vmem>>, %arg6: memref<8x384xbf16, #tpu.memory_space<vmem>>, %arg7: memref<1x384xf32, #tpu.memory_space<vmem>>, %arg8: memref<1x384xf32, #tpu.memory_space<vmem>>, %arg9: memref<1x1xf32, #tpu.memory_space<smem>>, %arg10: memref<128x1xf32, #tpu.memory_space<vmem>>) attributes {dimension_semantics = [#tpu.dimension_semantics<parallel>], iteration_bounds = array<i64: 1>, scalar_prefetch = 0 : i64, scratch_operands = 0 : i64, tpu.core_type = #tpu.core_type<tc>, window_params = [{transform_indices = @transform_0, window_bounds = array<i64: 128, 32>}, {transform_indices = @transform_1, window_bounds = array<i64: 128, 8>}, {pipeline_mode = #tpu.pipeline_mode<synchronous>, transform_indices = @transform_2, window_bounds = array<i64: 32, 512>}, {pipeline_mode = #tpu.pipeline_mode<synchronous>, transform_indices = @transform_3, window_bounds = array<i64: 1, 512>}, {pipeline_mode = #tpu.pipeline_mode<synchronous>, transform_indices = @transform_4, window_bounds = array<i64: 512, 384>}, {pipeline_mode = #tpu.pipeline_mode<synchronous>, transform_indices = @transform_5, window_bounds = array<i64: 8, 384>}, {pipeline_mode = #tpu.pipeline_mode<synchronous>, transform_indices = @transform_6, window_bounds = array<i64: 1, 384>}, {pipeline_mode = #tpu.pipeline_mode<synchronous>, transform_indices = @transform_7, window_bounds = array<i64: 1, 384>}, {transform_indices = @transform_8, window_bounds = array<i64: 1, 1>}, {transform_indices = @transform_9, window_bounds = array<i64: 128, 1>}]} {
    %c0 = arith.constant 0 : index
    %c0_0 = arith.constant 0 : index
    %0 = vector.load %arg1[%c0, %c0_0] : memref<128x32xf32, #tpu.memory_space<vmem>>, vector<128x32xf32>
    %1 = arith.truncf %0 : vector<128x32xf32> to vector<128x32xbf16>
    %c0_1 = arith.constant 0 : index
    %c0_2 = arith.constant 0 : index
    %2 = vector.load %arg3[%c0_1, %c0_2] : memref<32x512xbf16, #tpu.memory_space<vmem>>, vector<32x512xbf16>
    %cst = arith.constant dense<0.000000e+00> : vector<128x512xf32>
    %3 = tpu.matmul %1, %2, %cst {dimension_numbers = #tpu.dot_dimension_numbers<[1], [0], [0], [1], [0, 0, 1, 1], [], []>} : vector<128x32xbf16>, vector<32x512xbf16>, vector<128x512xf32> -> vector<128x512xf32>
    %c0_3 = arith.constant 0 : index
    %c0_4 = arith.constant 0 : index
    %4 = vector.load %arg4[%c0_3, %c0_4] : memref<1x512xf32, #tpu.memory_space<vmem>>, vector<1x512xf32>
    %5 = vector.broadcast %4 : vector<1x512xf32> to vector<128x512xf32>
    %6 = arith.addf %3, %5 : vector<128x512xf32>
    %7 = arith.truncf %6 : vector<128x512xf32> to vector<128x512xbf16>
    %cst_5 = arith.constant 0.000000e+00 : bf16
    %8 = vector.broadcast %cst_5 : bf16 to vector<128x512xbf16>
    %9 = arith.maximumf %7, %8 : vector<128x512xbf16>
    %c0_6 = arith.constant 0 : index
    %c0_7 = arith.constant 0 : index
    %10 = vector.load %arg5[%c0_6, %c0_7] : memref<512x384xbf16, #tpu.memory_space<vmem>>, vector<512x384xbf16>
    %cst_8 = arith.constant dense<0.000000e+00> : vector<128x384xf32>
    %11 = tpu.matmul %9, %10, %cst_8 {dimension_numbers = #tpu.dot_dimension_numbers<[1], [0], [0], [1], [0, 0, 1, 1], [], []>} : vector<128x512xbf16>, vector<512x384xbf16>, vector<128x384xf32> -> vector<128x384xf32>
    %c0_9 = arith.constant 0 : index
    %c0_10 = arith.constant 0 : index
    %12 = vector.load %arg2[%c0_9, %c0_10] : memref<128x8xf32, #tpu.memory_space<vmem>>, vector<128x8xf32>
    %13 = arith.truncf %12 : vector<128x8xf32> to vector<128x8xbf16>
    %c0_11 = arith.constant 0 : index
    %c0_12 = arith.constant 0 : index
    %14 = vector.load %arg6[%c0_11, %c0_12] : memref<8x384xbf16, #tpu.memory_space<vmem>>, vector<8x384xbf16>
    %cst_13 = arith.constant dense<0.000000e+00> : vector<128x384xf32>
    %15 = tpu.matmul %13, %14, %cst_13 {dimension_numbers = #tpu.dot_dimension_numbers<[1], [0], [0], [1], [0, 0, 1, 1], [], []>} : vector<128x8xbf16>, vector<8x384xbf16>, vector<128x384xf32> -> vector<128x384xf32>
    %16 = arith.addf %11, %15 : vector<128x384xf32>
    %c0_14 = arith.constant 0 : index
    %c0_15 = arith.constant 0 : index
    %17 = vector.load %arg7[%c0_14, %c0_15] : memref<1x384xf32, #tpu.memory_space<vmem>>, vector<1x384xf32>
    %18 = vector.broadcast %17 : vector<1x384xf32> to vector<128x384xf32>
    %19 = arith.addf %16, %18 : vector<128x384xf32>
    %cst_16 = arith.constant 0.000000e+00 : f32
    %20 = vector.broadcast %cst_16 : f32 to vector<128x384xf32>
    %21 = arith.maximumf %19, %20 : vector<128x384xf32>
    %c0_17 = arith.constant 0 : index
    %c0_18 = arith.constant 0 : index
    %22 = vector.load %arg8[%c0_17, %c0_18] : memref<1x384xf32, #tpu.memory_space<vmem>>, vector<1x384xf32>
    %23 = vector.broadcast %22 : vector<1x384xf32> to vector<128x384xf32>
    %24 = arith.mulf %21, %23 : vector<128x384xf32>
    %cst_19 = arith.constant dense<0.000000e+00> : vector<128xf32>
    %25 = vector.multi_reduction <add>, %24, %cst_19 [1] : vector<128x384xf32> to vector<128xf32>
    %26 = vector.shape_cast %25 : vector<128xf32> to vector<128x1xf32>
    %c0_20 = arith.constant 0 : index
    %c0_21 = arith.constant 0 : index
    %27 = memref.load %arg9[%c0_20, %c0_21] : memref<1x1xf32, #tpu.memory_space<smem>>
    %28 = vector.broadcast %27 : f32 to vector<128x1xf32>
    %29 = arith.addf %26, %28 : vector<128x1xf32>
    %c0_22 = arith.constant 0 : index
    %c0_23 = arith.constant 0 : index
    %30 = vector.load %arg10[%c0_22, %c0_23] : memref<128x1xf32, #tpu.memory_space<vmem>>, vector<128x1xf32>
    tpu.vector_store %arg10[%c0_22, %c0_23], %29 {strides = array<i32>} : memref<128x1xf32, #tpu.memory_space<vmem>>, vector<128x1xf32>,
    return
  }
  func.func @transform_0(%arg0: i32) -> (i32, i32) {
    %c0_i32 = arith.constant 0 : i32
    %c0_i32_0 = arith.constant 0 : i32
    return %arg0, %c0_i32 : i32, i32
  }
  func.func @transform_1(%arg0: i32) -> (i32, i32) {
    %c0_i32 = arith.constant 0 : i32
    %c0_i32_0 = arith.constant 0 : i32
    return %arg0, %c0_i32 : i32, i32
  }
  func.func @transform_2(%arg0: i32) -> (i32, i32) {
    %c0_i32 = arith.constant 0 : i32
    %c0_i32_0 = arith.constant 0 : i32
    %c0_i32_1 = arith.constant 0 : i32
    return %c0_i32, %c0_i32_0 : i32, i32
  }
  func.func @transform_3(%arg0: i32) -> (i32, i32) {
    %c0_i32 = arith.constant 0 : i32
    %c0_i32_0 = arith.constant 0 : i32
    %c0_i32_1 = arith.constant 0 : i32
    return %c0_i32, %c0_i32_0 : i32, i32
  }
  func.func @transform_4(%arg0: i32) -> (i32, i32) {
    %c0_i32 = arith.constant 0 : i32
    %c0_i32_0 = arith.constant 0 : i32
    %c0_i32_1 = arith.constant 0 : i32
    return %c0_i32, %c0_i32_0 : i32, i32
  }
  func.func @transform_5(%arg0: i32) -> (i32, i32) {
    %c0_i32 = arith.constant 0 : i32
    %c0_i32_0 = arith.constant 0 : i32
    %c0_i32_1 = arith.constant 0 : i32
    return %c0_i32, %c0_i32_0 : i32, i32
  }
  func.func @transform_6(%arg0: i32) -> (i32, i32) {
    %c0_i32 = arith.constant 0 : i32
    %c0_i32_0 = arith.constant 0 : i32
    %c0_i32_1 = arith.constant 0 : i32
    return %c0_i32, %c0_i32_0 : i32, i32
  }
  func.func @transform_7(%arg0: i32) -> (i32, i32) {
    %c0_i32 = arith.constant 0 : i32
    %c0_i32_0 = arith.constant 0 : i32
    %c0_i32_1 = arith.constant 0 : i32
    return %c0_i32, %c0_i32_0 : i32, i32
  }
  func.func @transform_8(%arg0: i32) -> (i32, i32) {
    %c0_i32 = arith.constant 0 : i32
    %c0_i32_0 = arith.constant 0 : i32
    %c0_i32_1 = arith.constant 0 : i32
    return %c0_i32, %c0_i32_0 : i32, i32
  }
  func.func @transform_9(%arg0: i32) -> (i32, i32) {
    %c0_i32 = arith.constant 0 : i32
    %c0_i32_0 = arith.constant 0 : i32
    return %arg0, %c0_i32 : i32, i32
  }
}

</mosaic_0001>

<bundles_post_ra>
// kernel: tpu_custom_call.1
= control target key start
LH: loop header
LB: loop body
LE: loop exit
PB: predicated region body
PF: predicated region fallthrough
CT: control target
= control target key end

     0   :  { %15 = vsyncpa [#allocation4], 0  ;;  %s2613_s30 = smov [#allocation3]   ;;  %s3437_s0 = inlined_call_operand.vmem [shape: f32[128,32], index: 0, kind: input, shape index: {}]   ;;  %s3438_s1 = inlined_call_operand.vmem [shape: f32[128,8], index: 1, kind: input, shape index: {}]   ;;  %s3439_s2 = inlined_call_operand.vmem [shape: bf16[32,512], index: 2, kind: input, shape index: {}]   ;;  %s3440_s3 = inlined_call_operand.vmem [shape: f32[1,512], index: 3, kind: input, shape index: {}]   ;;  %s3441_s4 = inlined_call_operand.hbm [shape: bf16[512,384], index: 4, kind: input, shape index: {}]   ;;  %s3442_s5 = inlined_call_operand.vmem [shape: bf16[8,384], index: 5, kind: input, shape index: {}]   ;;  %s3443_s6 = inlined_call_operand.vmem [shape: f32[1,384], index: 6, kind: input, shape index: {}]   ;;  %s3444_s7 = inlined_call_operand.vmem [shape: f32[1,384], index: 7, kind: input, shape index: {}]   ;;  %s3445_s8 = inlined_call_operand.<no memory space> [shape: f32[1,1], index: 8, kind: input, shape index: {}]   ;;  %s3446_s9 = inlined_call_operand.vmem [shape: f32[128,1], index: 9, kind: output, shape index: {}]  }
   0x1   :  { %s29_s10 = sshll.u32 %s2613_s30, 4  ;;  %s2589_s13 = scalar_lea.hbm %s3441_s4, 12288  ;;  %s30_s10 = int_to_ptr.vmem [resolvable:$true] %s29_s10 }
   0x2   :  { %p2590_p0 = scmp.ne.s32.totalorder %s3441_s4, %s2589_s13  ;;  %p2593_p1 = scmp.lt.u32.totalorder %s2589_s13, %s3441_s4 }
   0x4   :  { %p2595_p2 = pnand %p2593_p1, %p2590_p0 }
   0x6   :  { %2598 = shalt.err (!%p2595_p2)
}
   0x7   :  { %s2599_s18 = scalar_lea.vmem %s30_s10, 12288  ;;  %p2604_p4 = scmp.lt.s32.totalorder %s30_s10, %s30_s10 }
   0x8   :  { %p2600_p3 = scmp.ne.s32.totalorder %s30_s10, %s2599_s18  ;;  %p2605_p5 = scmp.lt.s32.totalorder %s2599_s18, %s2599_s18 }
   0xa   :  { %p2606_p6 = por %p2605_p5, %p2604_p4 }
   0xc   :  { %p2607_p7 = pnand %p2606_p6, %p2600_p3 }
   0xe   :  { %2610 = shalt.err (!%p2607_p7)
}
   0xf   :  { %s2614_s19 = smov 192   ;;  %s2615_s20 = smov 12  }
  0x10   :  { %35 = dma.hbm_to_vmem [thread:$0]  %s3441_s4, 12288, %s30_s10, [#allocation4], %s2614_s19, %s2614_s19, %s2615_s20  }
  0x11   :  { %2611 = dma.done.wait [#allocation4], 12288  }
  0x12   :  { %2612 = vsyncadd [#allocation4], 4294955008  ;;  %v2616_v0 = vmov 0   ;;  %v2446_v1 = vld [vmem:[%s3439_s2 + $0x4] ss:$16 sps:$4 sm:$0xff]   ;;  %v49_v6 = vld [vmem:[%s3437_s0 + $0x8] sm:$0xff] }
  0x13   :  { %199 = vmatprep.mubr.bf16.mxu0 %v2616_v0  ;;  %259 = vmatprep.mubr.bf16.mxu1 %v2616_v0  ;;  %v2448_v2 = vld [vmem:[%s3439_s2] ss:$16 sps:$4 sm:$0xff]   ;;  %v2449_v3 = vld [vmem:[%s3439_s2 + $0x24] ss:$16 sps:$4 sm:$0xff]   ;;  %vm142_vm0 = vcmask 261120   ;;  %v61_v9 = vld [vmem:[%s3437_s0 + $0x68] sm:$0xff] }
  0x14   :  { %167 = vmatprep.subr.bf16.mxu0 %v2446_v1  ;;  %2373 = vmatprep.subr.bf16.mxu1 %v2446_v1  ;;  %v2451_v4 = vld [vmem:[%s3439_s2 + $0x20] ss:$16 sps:$4 sm:$0xff]   ;;  %v2452_v11 = vld [vmem:[%s3439_s2 + $0x8] ss:$16 sps:$4 sm:$0xff]   ;;  %v2454_v12 = vld [vmem:[%s3439_s2 + $0xc] ss:$16 sps:$4 sm:$0xff]  }
  0x15   :  { %168 = vmatpush1.bf16.msra.mxu0 %v2448_v2  ;;  %v48_v5 = vld [vmem:[%s3437_s0] sm:$0xff]  ;;  %2375 = vmatpush1.bf16.msra.mxu1 %v2448_v2  ;;  %v50_v13 = vld [vmem:[%s3437_s0 + $0x10] sm:$0xff]  ;;  %v51_v14 = vld [vmem:[%s3437_s0 + $0x18] sm:$0xff]  ;;  %vm644_vm1 = vcmask 1043456   ;;  %vm619_vm2 = vcmask 64512   ;;  %vm2056_vm3 = vcmask 7168  }
  0x16   :  { %169 = vmatprep.subr.bf16.mxu0 %v2449_v3  ;;  %2374 = vmatprep.subr.bf16.mxu1 %v2449_v3  ;;  %v64_v7 = vpack.c.bf16 %v49_v6, %v48_v5  ;;  %v60_v8 = vld [vmem:[%s3437_s0 + $0x60] sm:$0xff]  ;;  %v2457_v15 = vld [vmem:[%s3439_s2 + $0x2c] ss:$16 sps:$4 sm:$0xff]   ;;  %v62_v17 = vld [vmem:[%s3437_s0 + $0x70] sm:$0xff]  ;;  %v65_v25 = vpack.c.bf16 %v51_v14, %v50_v13 }
  0x17   :  { %v2705_v10 = vpack.c.bf16 %v61_v9, %v60_v8  ;;  %v609_v16 = vld [vmem:[%s3442_s5] sm:$0xff]  ;;  %v63_v18 = vld [vmem:[%s3437_s0 + $0x78] sm:$0xff]  ;;  %v2460_v23 = vld [vmem:[%s3442_s5 + $0x8] ss:$0 sps:$4 sm:$0xff]  }
  0x18   :  { %v2103_v19 = vcombine.high %v609_v16, %v609_v16  ;;  %v2102_v20 = vcombine.low %v609_v16, %v609_v16  ;;  %v2455_v21 = vld [vmem:[%s3439_s2 + $0x28] ss:$16 sps:$4 sm:$0xff]   ;;  %v2463_v24 = vld [vmem:[#allocation3 + $0x4] ss:$12 sps:$4 sm:$0xff]   ;;  %v2744_v26 = vpack.c.bf16 %v63_v18, %v62_v17  ;;  %v652_v30 = vsel %vm644_vm1, %v2460_v23, 0 }
  0x19   :  { %170 = vmatpush1.bf16.msra.mxu0 %v2451_v4  ;;  %2376 = vmatpush1.bf16.msra.mxu1 %v2451_v4  ;;  %v52_v27 = vld [vmem:[%s3437_s0 + $0x20] sm:$0xff]  ;;  %v53_v28 = vld [vmem:[%s3437_s0 + $0x28] sm:$0xff]  ;;  %v54_v31 = vld [vmem:[%s3437_s0 + $0x30] sm:$0xff] }
  0x1a   :  { %280 = vmatprep.subr.bf16.mxu1 %v2454_v12  ;;  %2105 = vmatprep.subr.msk.bf16.mxu0 %vm644_vm1, %v2103_v19  ;;  %v646_v22 = vsel %vm644_vm1, %v2102_v20, 0  ;;  %v66_v29 = vpack.c.bf16 %v53_v28, %v52_v27  ;;  %v2485_v32 = vld [vmem:[#allocation3 + $0xc8] ss:$12 sps:$4 sm:$0xff]   ;;  %v55_v33 = vld [vmem:[%s3437_s0 + $0x38] sm:$0xff]  ;;  %v56_v35 = vld [vmem:[%s3437_s0 + $0x40] sm:$0xff] }
  0x1b   :  { %v67_v34 = vpack.c.bf16 %v55_v33, %v54_v31  ;;  %v57_v36 = vld [vmem:[%s3437_s0 + $0x48] sm:$0xff]  ;;  %v58_v38 = vld [vmem:[%s3437_s0 + $0x50] sm:$0xff]  ;;  %v59_v39 = vld [vmem:[%s3437_s0 + $0x58] sm:$0xff] }
  0x1c   :  { %2086 = vmatmul.mubr.msk.bf16.vlgmr.msra.gmra.mrb[0].mxu0 %vm142_vm0, %v64_v7  ;;  %2092 = vmatmul.mubr.msk.bf16.vlgmr.msra.gmra.mrb[0].mxu1 %vm142_vm0, %v2705_v10  ;;  %v68_v37 = vpack.c.bf16 %v57_v36, %v56_v35  ;;  %v69_v40 = vpack.c.bf16 %v59_v39, %v58_v38  ;;  %v585_v41 = vld [vmem:[%s3438_s1] sm:$0xff]  ;;  %v586_v42 = vld [vmem:[%s3438_s1 + $0x8] sm:$0xff]  ;;  %v587_v47 = vld [vmem:[%s3438_s1 + $0x10] sm:$0xff] }
  0x1d   :  { %209 = vmatprep.mubr.bf16.mxu0 %v2616_v0  ;;  %281 = vmatpush1.bf16.msra.mxu1 %v2452_v11  ;;  %v2461_v43 = vld [vmem:[#allocation3] ss:$12 sps:$4 sm:$0xff]   ;;  %v601_v44 = vpack.c.bf16 %v586_v42, %v585_v41  ;;  %v2466_v45 = vld [vmem:[#allocation3 + $0x1c] ss:$12 sps:$4 sm:$0xff]   ;;  %v2464_v46 = vld [vmem:[#allocation3 + $0x18] ss:$12 sps:$4 sm:$0xff]  }
  0x1e   :  { %269 = vmatprep.mubr.bf16.mxu1 %v2616_v0  ;;  %282 = vmatprep.subr.bf16.mxu1 %v2457_v15  ;;  %v588_v48 = vld [vmem:[%s3438_s1 + $0x18] sm:$0xff]  ;;  %v2469_v49 = vld [vmem:[#allocation3 + $0x34] ss:$12 sps:$4 sm:$0xff]   ;;  %v590_v55 = vld [vmem:[%s3438_s1 + $0x28] sm:$0xff] }
  0x1f   :  { %655 = vmatpush1.bf16.msra.mxu0 %v646_v22  ;;  %v2467_v50 = vld [vmem:[#allocation3 + $0x30] ss:$12 sps:$4 sm:$0xff]   ;;  %v602_v51 = vpack.c.bf16 %v588_v48, %v587_v47  ;;  %v2472_v52 = vld [vmem:[#allocation3 + $0x4c] ss:$12 sps:$4 sm:$0xff]   ;;  %v2470_v53 = vld [vmem:[#allocation3 + $0x48] ss:$12 sps:$4 sm:$0xff]  }
  0x20   :  { %1376 = vmatprep.subr.bf16.mxu0 %v2463_v24  ;;  %v589_v54 = vld [vmem:[%s3438_s1 + $0x20] sm:$0xff]  ;;  %v2478_v59 = vld [vmem:[#allocation3 + $0x7c] ss:$12 sps:$4 sm:$0xff]   ;;  %v591_v61 = vld [vmem:[%s3438_s1 + $0x30] sm:$0xff] }
  0x21   :  { %283 = vmatpush1.bf16.msra.mxu1 %v2455_v21  ;;  %v2475_v56 = vld [vmem:[#allocation3 + $0x64] ss:$12 sps:$4 sm:$0xff]   ;;  %v2473_v57 = vld [vmem:[#allocation3 + $0x60] ss:$12 sps:$4 sm:$0xff]   ;;  %v603_v58 = vpack.c.bf16 %v590_v55, %v589_v54  ;;  %v592_v62 = vld [vmem:[%s3438_s1 + $0x38] sm:$0xff] }
  0x22   :  { %2441 = vmatprep.subr.msk.bf16.mxu1 %vm644_vm1, %v2460_v23  ;;  %v2476_v60 = vld [vmem:[#allocation3 + $0x78] ss:$12 sps:$4 sm:$0xff]   ;;  %v2481_v63 = vld [vmem:[#allocation3 + $0x94] ss:$12 sps:$4 sm:$0xff]   ;;  %v604_v1 = vpack.c.bf16 %v592_v62, %v591_v61  ;;  %v2479_v2 = vld [vmem:[#allocation3 + $0x90] ss:$12 sps:$4 sm:$0xff]  }
  0x23   :  { %v2484_v3 = vld [vmem:[#allocation3 + $0xac] ss:$12 sps:$4 sm:$0xff]   ;;  %v2482_v4 = vld [vmem:[#allocation3 + $0xa8] ss:$12 sps:$4 sm:$0xff]   ;;  %v593_v5 = vld [vmem:[%s3438_s1 + $0x40] sm:$0xff] }
  0x24   :  { %2087 = vmatmul.mubr.msk.bf16.gmra.mrb[4].mxu0 %vm142_vm0, %v65_v25  ;;  %2093 = vmatmul.mubr.msk.bf16.gmra.mrb[4].mxu1 %vm142_vm0, %v2744_v26  ;;  %v594_v6 = vld [vmem:[%s3438_s1 + $0x48] sm:$0xff]  ;;  %v2491_v13 = vld [vmem:[#allocation3 + $0xd8] ss:$12 sps:$4 sm:$0xff]   ;;  %v595_v15 = vld [vmem:[%s3438_s1 + $0x50] sm:$0xff] }
  0x25   :  { %219 = vmatprep.mubr.bf16.mxu0 %v2616_v0  ;;  %312 = vmatprep.mubr.bf16.mxu1 %v2616_v0  ;;  %v605_v8 = vpack.c.bf16 %v594_v6, %v593_v5  ;;  %v2486_v9 = vld [vmem:[#allocation3 + $0xc0] ss:$12 sps:$4 sm:$0xff]   ;;  %v2493_v12 = vld [vmem:[#allocation3 + $0xdc] ss:$12 sps:$4 sm:$0xff]   ;;  %v2495_v17 = vld [vmem:[#allocation3 + $0xf8] ss:$12 sps:$4 sm:$0xff]  }
  0x26   :  { %v2490_v11 = vld [vmem:[#allocation3 + $0xe0] ss:$12 sps:$4 sm:$0xff]   ;;  %v596_v16 = vld [vmem:[%s3438_s1 + $0x58] sm:$0xff]  ;;  %v2501_v24 = vld [vmem:[#allocation3 + $0x108] ss:$12 sps:$4 sm:$0xff]  }
  0x27   :  { %v2494_v14 = vld [vmem:[#allocation3 + $0x20] ss:$12 sps:$4 sm:$0xff]   ;;  %v606_v19 = vpack.c.bf16 %v596_v16, %v595_v15  ;;  %v2496_v20 = vld [vmem:[#allocation3 + $0xf0] ss:$12 sps:$4 sm:$0xff]   ;;  %v2499_v21 = vld [vmem:[#allocation3 + $0x38] ss:$12 sps:$4 sm:$0xff]  }
  0x28   :  { %v2498_v18 = vld [vmem:[#allocation3 + $0xf4] ss:$12 sps:$4 sm:$0xff]   ;;  %v2500_v22 = vld [vmem:[#allocation3 + $0x110] ss:$12 sps:$4 sm:$0xff]   ;;  %v2503_v23 = vld [vmem:[#allocation3 + $0x10c] ss:$12 sps:$4 sm:$0xff]  }
  0x29   :  { %v598_v27 = vld [vmem:[%s3438_s1 + $0x68] sm:$0xff]  ;;  %v2511_v35 = vld [vmem:[#allocation3 + $0x138] ss:$12 sps:$4 sm:$0xff]   ;;  %v2516_v42 = vld [vmem:[#allocation3 + $0x150] ss:$12 sps:$4 sm:$0xff]  }
  0x2a   :  { %v2505_v28 = vld [vmem:[#allocation3 + $0x128] ss:$12 sps:$4 sm:$0xff]   ;;  %v2506_v31 = vld [vmem:[#allocation3 + $0x120] ss:$12 sps:$4 sm:$0xff]   ;;  %v600_v38 = vld [vmem:[%s3438_s1 + $0x78] sm:$0xff] }
  0x2b   :  { %v2510_v33 = vld [vmem:[#allocation3 + $0x140] ss:$12 sps:$4 sm:$0xff]   ;;  %v2515_v39 = vld [vmem:[#allocation3 + $0x158] ss:$12 sps:$4 sm:$0xff]   ;;  %v2524_v47 = vld [vmem:[#allocation3 + $0xb0] ss:$12 sps:$4 sm:$0xff]  }
  0x2c   :  { %2088 = vmatmul.mubr.msk.bf16.gmra.mrb[8].mxu0 %vm142_vm0, %v66_v29  ;;  %2094 = vmatmul.mubr.msk.bf16.vlgmr.msra.gmra.mrb[8].mxu1 %vm142_vm0, %v64_v7  ;;  %v2488_v7 = vld [vmem:[#allocation3 + $0xc4] ss:$12 sps:$4 sm:$0xff]   ;;  %v2514_v36 = vld [vmem:[#allocation3 + $0x80] ss:$12 sps:$4 sm:$0xff]   ;;  %v2525_v48 = vld [vmem:[#allocation3 + $0x248] ss:$12 sps:$4 sm:$0xff]  }
  0x2d   :  { %229 = vmatprep.mubr.bf16.mxu0 %v2616_v0  ;;  %322 = vmatprep.mubr.bf16.mxu1 %v2616_v0 }
  0x2e   :  { %2356 = vmatpush3.bf16.msra.mxu1 %v652_v30 }
  0x2f   :  { %2227 = vmatprep.subr.bf16.mxu1 %v2485_v32  ;;  %v2509_v32 = vld [vmem:[#allocation3 + $0x68] ss:$12 sps:$4 sm:$0xff]  }
  0x34   :  { %2089 = vmatmul.mubr.msk.bf16.gmra.mrb[12].mxu0 %vm142_vm0, %v67_v34  ;;  %2095 = vmatmul.mubr.msk.bf16.gmra.mrb[12].mxu1 %vm142_vm0, %v65_v25  ;;  %v2504_v25 = vld [vmem:[#allocation3 + $0x50] ss:$12 sps:$4 sm:$0xff]  }
  0x35   :  { %239 = vmatprep.mubr.bf16.mxu0 %v2616_v0  ;;  %332 = vmatprep.mubr.bf16.mxu1 %v2616_v0 }
  0x3c   :  { %2090 = vmatmul.mubr.msk.bf16.gmra.mrb[16].mxu0 %vm142_vm0, %v68_v37  ;;  %2096 = vmatmul.mubr.msk.bf16.gmra.mrb[16].mxu1 %vm142_vm0, %v66_v29  ;;  %v2508_v29 = vld [vmem:[#allocation3 + $0x124] ss:$12 sps:$4 sm:$0xff]  }
  0x3d   :  { %249 = vmatprep.mubr.bf16.mxu0 %v2616_v0  ;;  %342 = vmatprep.mubr.bf16.mxu1 %v2616_v0 }
  0x44   :  { %2091 = vmatmul.mubr.msk.bf16.gmra.mrb[20].mxu0 %vm142_vm0, %v69_v40  ;;  %2097 = vmatmul.mubr.msk.bf16.gmra.mrb[20].mxu1 %vm142_vm0, %v67_v34  ;;  %v2513_v34 = vld [vmem:[#allocation3 + $0x13c] ss:$12 sps:$4 sm:$0xff]  }
  0x45   :  { %352 = vmatprep.mubr.bf16.mxu1 %v2616_v0  ;;  %686 = vmatprep.mubr.bf16.mxu0 %v2616_v0 }
  0x4c   :  { %2098 = vmatmul.mubr.msk.bf16.gmra.mrb[24].mxu1 %vm142_vm0, %v68_v37  ;;  %2106 = vmatmul.mubr.msk.bf16.vlgmr.msra.gmra.mrb[24].mxu0 %vm619_vm2, %v601_v44  ;;  %v599_v37 = vld [vmem:[%s3438_s1 + $0x70] sm:$0xff] }
  0x4d   :  { %362 = vmatprep.mubr.bf16.mxu1 %v2616_v0  ;;  %1377 = vmatpush1.bf16.msra.mxu0 %v2461_v43  ;;  %v608_v41 = vpack.c.bf16 %v600_v38, %v599_v37  ;;  %v2519_v43 = vld [vmem:[#allocation3 + $0x98] ss:$12 sps:$4 sm:$0xff]   ;;  %v2537_v38 = vld [vmem:[#allocation3 + $0x1a0] ss:$12 sps:$4 sm:$0xff]  }
  0x4e   :  { %1378 = vmatprep.subr.bf16.mxu0 %v2466_v45  ;;  %696 = vmatprep.mubr.bf16.mxu0 %v2616_v0  ;;  %v2523_v45 = vld [vmem:[#allocation3 + $0x16c] ss:$12 sps:$4 sm:$0xff]  }
  0x4f   :  { %v2530_v37 = vld [vmem:[#allocation3 + $0x198] ss:$12 sps:$4 sm:$0xff]  }
  0x51   :  { %1379 = vmatpush1.bf16.msra.mxu0 %v2464_v46  ;;  %v2521_v46 = vld [vmem:[#allocation3 + $0x168] ss:$12 sps:$4 sm:$0xff]  }
  0x52   :  { %1380 = vmatprep.subr.bf16.mxu0 %v2469_v49  ;;  %v2528_v49 = vld [vmem:[#allocation3 + $0x184] ss:$12 sps:$4 sm:$0xff]  }
  0x54   :  { %2099 = vmatmul.mubr.msk.bf16.gmra.mrb[28].mxu1 %vm142_vm0, %v69_v40  ;;  %2107 = vmatmul.mubr.msk.bf16.gmra.mrb[28].mxu0 %vm619_vm2, %v602_v51  ;;  %v2518_v40 = vld [vmem:[#allocation3 + $0x154] ss:$12 sps:$4 sm:$0xff]  }
  0x55   :  { %372 = vmatprep.mubr.bf16.mxu1 %v2616_v0  ;;  %1381 = vmatpush1.bf16.msra.mxu0 %v2467_v50  ;;  %v82_v50 = vlaneseq }
  0x56   :  { %1382 = vmatprep.subr.bf16.mxu0 %v2472_v52  ;;  %706 = vmatprep.mubr.bf16.mxu0 %v2616_v0 }
  0x59   :  { %1383 = vmatpush1.bf16.msra.mxu0 %v2470_v53  ;;  %v2881_v53 = vld [vmem:[%s3440_s3] sm:$0xf] }
  0x5a   :  { %1384 = vmatprep.subr.bf16.mxu0 %v2475_v56 }
  0x5c   :  { %2100 = vmatmul.mubr.msk.bf16.gmra.mrb[32].mxu1 %vm142_vm0, %v2705_v10  ;;  %2108 = vmatmul.mubr.msk.bf16.gmra.mrb[32].mxu0 %vm619_vm2, %v603_v58  ;;  %v2489_v10 = vld [vmem:[#allocation3 + $0x8] ss:$12 sps:$4 sm:$0xff]  }
  0x5d   :  { %382 = vmatprep.mubr.bf16.mxu1 %v2616_v0  ;;  %1385 = vmatpush1.bf16.msra.mxu0 %v2473_v57 }
  0x5e   :  { %1386 = vmatprep.subr.bf16.mxu0 %v2478_v59  ;;  %716 = vmatprep.mubr.bf16.mxu0 %v2616_v0 }
  0x61   :  { %1387 = vmatpush1.bf16.msra.mxu0 %v2476_v60 }
  0x62   :  { %1388 = vmatprep.subr.bf16.mxu0 %v2481_v63 }
  0x64   :  { %2101 = vmatmul.mubr.msk.bf16.gmra.mrb[36].mxu1 %vm142_vm0, %v2744_v26  ;;  %2109 = vmatmul.mubr.msk.bf16.gmra.mrb[36].mxu0 %vm619_vm2, %v604_v1  ;;  %v597_v26 = vld [vmem:[%s3438_s1 + $0x60] sm:$0xff] }
  0x65   :  { %1389 = vmatpush1.bf16.msra.mxu0 %v2479_v2  ;;  %2357 = vmatprep.mubr.msk.bf16.mxu1 %vm619_vm2, %v601_v44  ;;  %v607_v30 = vpack.c.bf16 %v598_v27, %v597_v26  ;;  %v2520_v44 = vld [vmem:[#allocation3 + $0x170] ss:$12 sps:$4 sm:$0xff]  }
  0x66   :  { %1390 = vmatprep.subr.bf16.mxu0 %v2484_v3  ;;  %726 = vmatprep.mubr.bf16.mxu0 %v2616_v0 }
  0x69   :  { %1391 = vmatpush1.bf16.msra.mxu0 %v2482_v4 }
  0x6a   :  { %1392 = vmatprep.subr.bf16.mxu0 %v2488_v7 }
  0x6c   :  { %2358 = vmatmul.mubr.msk.bf16.vlgmr.msra.gmra.mrb[40].mxu1 %vm619_vm2, %v602_v51  ;;  %2110 = vmatmul.mubr.msk.bf16.gmra.mrb[40].mxu0 %vm619_vm2, %v605_v8  ;;  %v2873_v51 = vshrl.u32 %v82_v50, 7  ;;  %v2534_v50 = vld [vmem:[#allocation3 + $0x1b0] ss:$12 sps:$4 sm:$0xff]  }
  0x6d   :  { %2228 = vmatpush3.bf16.msra.mxu1 %v2489_v10  ;;  %1393 = vmatpush1.bf16.msra.mxu0 %v2486_v9 }
  0x6e   :  { %2229 = vmatprep.subr.bf16.mxu1 %v2490_v11  ;;  %2361 = vmatprep.mubr.msk.bf16.mxu1 %vm619_vm2, %v603_v58  ;;  %v2876_v52 = vsub.s32 0, %v2873_v51  ;;  %v2884_v54 = vsub.s32 1, %v2873_v51 }
  0x6f   :  { %1394 = vmatprep.subr.bf16.mxu0 %v2493_v12  ;;  %736 = vmatprep.mubr.bf16.mxu0 %v2616_v0 }
  0x70   :  { %v2888_v55 = vrot.slane %v2881_v53, %v2876_v52  ;;  %v2892_v57 = vrot.slane %v2881_v53, %v2884_v54 }
  0x71   :  { %2230 = vmatpush3.bf16.msra.mxu1 %v2494_v14  ;;  %1395 = vmatpush1.bf16.msra.mxu0 %v2491_v13  ;;  %v2526_v14 = vld [vmem:[#allocation3 + $0x180] ss:$12 sps:$4 sm:$0xff]  }
  0x72   :  { %2231 = vmatprep.subr.bf16.mxu1 %v2495_v17  ;;  %1396 = vmatprep.subr.bf16.mxu0 %v2498_v18  ;;  %v2529_v17 = vld [vmem:[#allocation3 + $0x188] ss:$12 sps:$4 sm:$0xff]  }
  0x73   :  { %v2532_v18 = vld [vmem:[#allocation3 + $0x19c] ss:$12 sps:$4 sm:$0xff]  }
  0x74   :  { %2362 = vmatmul.mubr.msk.bf16.gmra.mrb[44].mxu1 %vm619_vm2, %v604_v1  ;;  %2111 = vmatmul.mubr.msk.bf16.gmra.mrb[44].mxu0 %vm619_vm2, %v606_v19 }
  0x75   :  { %2232 = vmatpush3.bf16.msra.mxu1 %v2499_v21  ;;  %1397 = vmatpush1.bf16.msra.mxu0 %v2496_v20 }
  0x76   :  { %2233 = vmatprep.subr.bf16.mxu1 %v2500_v22  ;;  %2365 = vmatprep.mubr.msk.bf16.mxu1 %vm619_vm2, %v605_v8  ;;  %v2533_v22 = vld [vmem:[#allocation3 + $0x260] ss:$12 sps:$4 sm:$0xff]  }
  0x77   :  { %1398 = vmatprep.subr.bf16.mxu0 %v2503_v23  ;;  %746 = vmatprep.mubr.bf16.mxu0 %v2616_v0 }
  0x79   :  { %2234 = vmatpush3.bf16.msra.mxu1 %v2504_v25  ;;  %1399 = vmatpush1.bf16.msra.mxu0 %v2501_v24  ;;  %v2920_v25 = vsub.s32 2, %v2873_v51 }
  0x7a   :  { %2235 = vmatprep.subr.bf16.mxu1 %v2505_v28  ;;  %1400 = vmatprep.subr.bf16.mxu0 %v2508_v29  ;;  %v96_v29 = vsub.s32 3, %v2873_v51  ;;  %v2545_v51 = vld [vmem:[#allocation3 + $0x1b8] ss:$12 sps:$4 sm:$0xff]  }
  0x7c   :  { %2366 = vmatmul.mubr.msk.bf16.gmra.mrb[48].mxu1 %vm619_vm2, %v606_v19  ;;  %2112 = vmatmul.mubr.msk.bf16.gmra.mrb[48].mxu0 %vm619_vm2, %v607_v30 }
  0x7d   :  { %2236 = vmatpush3.bf16.msra.mxu1 %v2509_v32  ;;  %1401 = vmatpush1.bf16.msra.mxu0 %v2506_v31 }
  0x7e   :  { %2237 = vmatprep.subr.bf16.mxu1 %v2510_v33  ;;  %2369 = vmatprep.mubr.msk.bf16.mxu1 %vm619_vm2, %v607_v30 }
  0x7f   :  { %1402 = vmatprep.subr.bf16.mxu0 %v2513_v34  ;;  %756 = vmatprep.mubr.bf16.mxu0 %v2616_v0 }
  0x81   :  { %2238 = vmatpush3.bf16.msra.mxu1 %v2514_v36  ;;  %1403 = vmatpush1.bf16.msra.mxu0 %v2511_v35 }
  0x82   :  { %2239 = vmatprep.subr.bf16.mxu1 %v2515_v39  ;;  %1404 = vmatprep.subr.bf16.mxu0 %v2518_v40 }
  0x84   :  { %2370 = vmatmul.mubr.msk.bf16.gmra.mrb[52].mxu1 %vm619_vm2, %v608_v41  ;;  %2113 = vmatmul.mubr.msk.bf16.gmra.mrb[52].mxu0 %vm619_vm2, %v608_v41  ;;  %v2536_v41 = vld [vmem:[#allocation3 + $0x1b4] ss:$12 sps:$4 sm:$0xff]  }
  0x85   :  { %2240 = vmatpush3.bf16.msra.mxu1 %v2519_v43  ;;  %1405 = vmatpush1.bf16.msra.mxu0 %v2516_v42  ;;  %v2541_v42 = vld [vmem:[#allocation3 + $0x278] ss:$12 sps:$4 sm:$0xff]  }
  0x86   :  { %2241 = vmatprep.subr.bf16.mxu1 %v2520_v44  ;;  %1406 = vmatprep.subr.bf16.mxu0 %v2523_v45  ;;  %v2940_v44 = vrot.slane %v2881_v53, %v2920_v25 }
  0x89   :  { %2242 = vmatpush3.bf16.msra.mxu1 %v2524_v47  ;;  %1407 = vmatpush1.bf16.msra.mxu0 %v2521_v46  ;;  %v2945_v47 = vrot.slane %v2881_v53, %v96_v29 }
  0x8a   :  { %2291 = vmatprep.subr.bf16.mxu1 %v2525_v48  ;;  %1489 = vmatprep.subr.bf16.mxu0 %v2528_v49 }
  0xef   :  { %v201_v56 = vpop.f32.mrb[0].mxu0  ;;  %v261_v58 = vpop.f32.mrb[0].mxu1 }
  0xf0   :  { %v203_v59 = vpop.f32.mrb[1].mxu0  ;;  %v2895_v60 = vadd.f32 %v261_v58, %v2888_v55  ;;  %v263_v61 = vpop.f32.mrb[1].mxu1  ;;  %v202_v2 = vadd.f32 %v201_v56, %v2888_v55 }
  0xf1   :  { %v205_v62 = vpop.f32.mrb[2].mxu0  ;;  %v2898_v63 = vadd.f32 %v263_v61, %v2892_v57  ;;  %v265_v1 = vpop.f32.mrb[2].mxu1  ;;  %v204_v7 = vadd.f32 %v203_v59, %v2892_v57  ;;  %v2540_v61 = vld [vmem:[#allocation3 + $0x1cc] ss:$12 sps:$4 sm:$0xff]  }
  0xf2   :  { %v206_v3 = vadd.f32 %v205_v62, %v2888_v55  ;;  %v207_v4 = vpop.f32.mrb[3].mxu0  ;;  %v2903_v5 = vadd.f32 %v265_v1, %v2888_v55  ;;  %v267_v6 = vpop.f32.mrb[3].mxu1  ;;  %v2549_v62 = vld [vmem:[#allocation3 + $0x290] ss:$12 sps:$4 sm:$0xff]  }
  0xf3   :  { %v208_v8 = vadd.f32 %v207_v4, %v2892_v57  ;;  %v2908_v9 = vadd.f32 %v267_v6, %v2892_v57 }
  0xf4   :  { %v393_v10 = vpack.c.bf16 %v206_v3, %v202_v2  ;;  %v417_v11 = vpack.c.bf16 %v2903_v5, %v2895_v60  ;;  %v2578_v60 = vld [vmem:[#allocation3 + $0x2b8] ss:$12 sps:$4 sm:$0xff]  }
  0xf5   :  { %v394_v12 = vpack.c.bf16 %v208_v8, %v204_v7  ;;  %v418_v13 = vpack.c.bf16 %v2908_v9, %v2898_v63 }
  0xf6   :  { %v425_v20 = vmax.bf16 %v2616_v0, %v393_v10 }
  0xf7   :  { %v211_v15 = vpop.f32.mrb[4].mxu0  ;;  %v426_v16 = vmax.bf16 %v2616_v0, %v394_v12  ;;  %v271_v19 = vpop.f32.mrb[4].mxu1 }
  0xf8   :  { %v213_v21 = vpop.f32.mrb[5].mxu0  ;;  %v2917_v23 = vadd.f32 %v271_v19, %v2888_v55  ;;  %v273_v24 = vpop.f32.mrb[5].mxu1  ;;  %v212_v30 = vadd.f32 %v211_v15, %v2888_v55 }
  0xf9   :  { %v215_v26 = vpop.f32.mrb[6].mxu0  ;;  %1408 = vmatprep.mubr.bf16.mxu0 %v426_v16  ;;  %1634 = vmatprep.mubr.bf16.mxu1 %v426_v16  ;;  %v2923_v27 = vadd.f32 %v273_v24, %v2892_v57  ;;  %v275_v28 = vpop.f32.mrb[6].mxu1  ;;  %v214_v35 = vadd.f32 %v213_v21, %v2892_v57  ;;  %v2538_v16 = vld [vmem:[#allocation3 + $0x1c8] ss:$12 sps:$4 sm:$0xff]  }
  0xfa   :  { %v216_v31 = vadd.f32 %v215_v26, %v2888_v55  ;;  %v217_v32 = vpop.f32.mrb[7].mxu0  ;;  %1409 = vmatmul.mubr.bf16.vlgmr.msra.gmra.mrb[24].mxu0 %v425_v20  ;;  %1635 = vmatmul.mubr.bf16.vlgmr.msra.gmra.mrb[56].mxu1 %v425_v20  ;;  %v2929_v33 = vadd.f32 %v275_v28, %v2888_v55  ;;  %v277_v34 = vpop.f32.mrb[7].mxu1  ;;  %v2544_v20 = vld [vmem:[#allocation3 + $0x1e4] ss:$12 sps:$4 sm:$0xff]   ;;  %v2557_v21 = vld [vmem:[#allocation3 + $0x2a8] ss:$12 sps:$4 sm:$0xff]  }
  0xfb   :  { %v218_v36 = vadd.f32 %v217_v32, %v2892_v57  ;;  %2292 = vmatpush3.bf16.msra.mxu1 %v2529_v17  ;;  %1490 = vmatpush1.bf16.msra.mxu0 %v2526_v14  ;;  %v2934_v39 = vadd.f32 %v277_v34, %v2892_v57  ;;  %v2553_v17 = vld [vmem:[#allocation3 + $0x1d0] ss:$12 sps:$4 sm:$0xff]  }
  0xfc   :  { %v397_v40 = vpack.c.bf16 %v216_v31, %v212_v30  ;;  %1491 = vmatprep.subr.bf16.mxu0 %v2532_v18  ;;  %2293 = vmatprep.subr.bf16.mxu1 %v2533_v22  ;;  %v421_v43 = vpack.c.bf16 %v2929_v33, %v2917_v23  ;;  %v2542_v30 = vld [vmem:[#allocation3 + $0x1e0] ss:$12 sps:$4 sm:$0xff]   ;;  %v2561_v31 = vld [vmem:[#allocation3 + $0x1e8] ss:$12 sps:$4 sm:$0xff]  }
  0xfd   :  { %v398_v45 = vpack.c.bf16 %v218_v36, %v214_v35  ;;  %v422_v46 = vpack.c.bf16 %v2934_v39, %v2923_v27  ;;  %v2548_v36 = vld [vmem:[#allocation3 + $0x1fc] ss:$12 sps:$4 sm:$0xff]  }
  0xfe   :  { %v429_v59 = vmax.bf16 %v2616_v0, %v397_v40  ;;  %v2586_v23 = vld [vmem:[#allocation3 + $0x2e8] ss:$12 sps:$4 sm:$0xff]  }
  0xff   :  { %v221_v48 = vpop.f32.mrb[8].mxu0  ;;  %1492 = vmatpush1.bf16.msra.mxu0 %v2530_v37  ;;  %v430_v49 = vmax.bf16 %v2616_v0, %v398_v45  ;;  %2294 = vmatpush3.bf16.msra.mxu1 %v2537_v38  ;;  %v314_v56 = vpop.f32.mrb[8].mxu1  ;;  %v2565_v37 = vld [vmem:[#allocation3 + $0x2c0] ss:$12 sps:$4 sm:$0xff]  }
 0x100   :  { %v223_v58 = vpop.f32.mrb[9].mxu0  ;;  %1493 = vmatprep.subr.bf16.mxu0 %v2536_v41  ;;  %2295 = vmatprep.subr.bf16.mxu1 %v2541_v42  ;;  %v2950_v1 = vadd.f32 %v314_v56, %v2940_v44  ;;  %v316_v53 = vpop.f32.mrb[9].mxu1  ;;  %v222_v6 = vadd.f32 %v221_v48, %v2888_v55 }
 0x101   :  { %v225_v2 = vpop.f32.mrb[10].mxu0  ;;  %1418 = vmatprep.mubr.bf16.mxu0 %v430_v49  ;;  %1642 = vmatprep.mubr.bf16.mxu1 %v430_v49  ;;  %v2953_v3 = vadd.f32 %v316_v53, %v2945_v47  ;;  %v318_v4 = vpop.f32.mrb[10].mxu1  ;;  %v224_v14 = vadd.f32 %v223_v58, %v2892_v57 }
 0x102   :  { %v226_v7 = vadd.f32 %v225_v2, %v2888_v55  ;;  %v227_v8 = vpop.f32.mrb[11].mxu0  ;;  %1419 = vmatmul.mubr.bf16.gmra.mrb[28].mxu0 %v429_v59  ;;  %1643 = vmatmul.mubr.bf16.gmra.mrb[60].mxu1 %v429_v59  ;;  %v2958_v10 = vadd.f32 %v318_v4, %v2940_v44  ;;  %v320_v12 = vpop.f32.mrb[11].mxu1  ;;  %v2552_v4 = vld [vmem:[#allocation3 + $0x214] ss:$12 sps:$4 sm:$0xff]  }
 0x103   :  { %v228_v15 = vadd.f32 %v227_v8, %v2892_v57  ;;  %1494 = vmatpush1.bf16.msra.mxu0 %v2534_v50  ;;  %2296 = vmatpush3.bf16.msra.mxu1 %v2545_v51  ;;  %v2963_v18 = vadd.f32 %v320_v12, %v2945_v47 }
 0x104   :  { %v401_v19 = vpack.c.bf16 %v226_v7, %v222_v6  ;;  %1495 = vmatprep.subr.bf16.mxu0 %v2540_v61  ;;  %2297 = vmatprep.subr.bf16.mxu1 %v2549_v62  ;;  %v395_v22 = vpack.c.bf16 %v2958_v10, %v2950_v1  ;;  %v2546_v61 = vld [vmem:[#allocation3 + $0x1f8] ss:$12 sps:$4 sm:$0xff]   ;;  %v2569_v62 = vld [vmem:[#allocation3 + $0x200] ss:$12 sps:$4 sm:$0xff]  }
 0x105   :  { %v402_v24 = vpack.c.bf16 %v228_v15, %v224_v14  ;;  %v396_v26 = vpack.c.bf16 %v2963_v18, %v2953_v3  ;;  %v2573_v6 = vld [vmem:[#allocation3 + $0x2d8] ss:$12 sps:$4 sm:$0xff]  }
 0x106   :  { %v433_v35 = vmax.bf16 %v2616_v0, %v401_v19 }
 0x107   :  { %v231_v28 = vpop.f32.mrb[12].mxu0  ;;  %1496 = vmatpush1.bf16.msra.mxu0 %v2538_v16  ;;  %v434_v29 = vmax.bf16 %v2616_v0, %v402_v24  ;;  %2298 = vmatpush3.bf16.msra.mxu1 %v2553_v17  ;;  %v324_v32 = vpop.f32.mrb[12].mxu1  ;;  %v2550_v16 = vld [vmem:[#allocation3 + $0x210] ss:$12 sps:$4 sm:$0xff]   ;;  %v2577_v17 = vld [vmem:[#allocation3 + $0x218] ss:$12 sps:$4 sm:$0xff]  }
 0x108   :  { %v233_v34 = vpop.f32.mrb[13].mxu0  ;;  %1497 = vmatprep.subr.bf16.mxu0 %v2544_v20  ;;  %2299 = vmatprep.subr.bf16.mxu1 %v2557_v21  ;;  %v2972_v38 = vadd.f32 %v324_v32, %v2940_v44  ;;  %v326_v40 = vpop.f32.mrb[13].mxu1  ;;  %v232_v48 = vadd.f32 %v231_v28, %v2888_v55  ;;  %v2556_v24 = vld [vmem:[#allocation3 + $0x22c] ss:$12 sps:$4 sm:$0xff]   ;;  %v2581_v28 = vld [vmem:[#allocation3 + $0x2f0] ss:$12 sps:$4 sm:$0xff]  }
 0x109   :  { %v235_v41 = vpop.f32.mrb[14].mxu0  ;;  %1428 = vmatprep.mubr.bf16.mxu0 %v434_v29  ;;  %1650 = vmatprep.mubr.bf16.mxu1 %v434_v29  ;;  %v2975_v42 = vadd.f32 %v326_v40, %v2945_v47  ;;  %v328_v45 = vpop.f32.mrb[14].mxu1  ;;  %v234_v58 = vadd.f32 %v233_v34, %v2892_v57 }
 0x10a   :  { %v236_v49 = vadd.f32 %v235_v41, %v2888_v55  ;;  %v237_v50 = vpop.f32.mrb[15].mxu0  ;;  %1429 = vmatmul.mubr.bf16.gmra.mrb[32].mxu0 %v433_v35  ;;  %1651 = vmatmul.mubr.bf16.gmra.mrb[64].mxu1 %v433_v35  ;;  %v2980_v51 = vadd.f32 %v328_v45, %v2940_v44  ;;  %v330_v56 = vpop.f32.mrb[15].mxu1 }
 0x10b   :  { %v238_v59 = vadd.f32 %v237_v50, %v2892_v57  ;;  %1498 = vmatpush1.bf16.msra.mxu0 %v2542_v30  ;;  %2300 = vmatpush3.bf16.msra.mxu1 %v2561_v31  ;;  %v2985_v53 = vadd.f32 %v330_v56, %v2945_v47  ;;  %v2585_v50 = vld [vmem:[#allocation3 + $0x230] ss:$12 sps:$4 sm:$0xff]  }
 0x10c   :  { %v405_v2 = vpack.c.bf16 %v236_v49, %v232_v48  ;;  %1499 = vmatprep.subr.bf16.mxu0 %v2548_v36  ;;  %2301 = vmatprep.subr.bf16.mxu1 %v2565_v37  ;;  %v399_v7 = vpack.c.bf16 %v2980_v51, %v2972_v38  ;;  %v2554_v49 = vld [vmem:[#allocation3 + $0x228] ss:$12 sps:$4 sm:$0xff]  }
 0x10d   :  { %v406_v8 = vpack.c.bf16 %v238_v59, %v234_v58  ;;  %v400_v12 = vpack.c.bf16 %v2985_v53, %v2975_v42  ;;  %v2560_v59 = vld [vmem:[#allocation3 + $0x244] ss:$12 sps:$4 sm:$0xff]  }
 0x10e   :  { %v437_v21 = vmax.bf16 %v2616_v0, %v405_v2 }
 0x10f   :  { %v241_v14 = vpop.f32.mrb[16].mxu0  ;;  %1500 = vmatpush1.bf16.msra.mxu0 %v2546_v61  ;;  %v438_v15 = vmax.bf16 %v2616_v0, %v406_v8  ;;  %2302 = vmatpush3.bf16.msra.mxu1 %v2569_v62  ;;  %v334_v19 = vpop.f32.mrb[16].mxu1  ;;  %v2558_v8 = vld [vmem:[#allocation3 + $0x240] ss:$12 sps:$4 sm:$0xff]  }
 0x110   :  { %v243_v20 = vpop.f32.mrb[17].mxu0  ;;  %1501 = vmatprep.subr.bf16.mxu0 %v2552_v4  ;;  %2303 = vmatprep.subr.bf16.mxu1 %v2573_v6  ;;  %v2994_v29 = vadd.f32 %v334_v19, %v2940_v44  ;;  %v336_v30 = vpop.f32.mrb[17].mxu1  ;;  %v242_v35 = vadd.f32 %v241_v14, %v2888_v55 }
 0x111   :  { %v245_v31 = vpop.f32.mrb[18].mxu0  ;;  %1438 = vmatprep.mubr.bf16.mxu0 %v438_v15  ;;  %1658 = vmatprep.mubr.bf16.mxu1 %v438_v15  ;;  %v2997_v32 = vadd.f32 %v336_v30, %v2945_v47  ;;  %v338_v34 = vpop.f32.mrb[18].mxu1  ;;  %v244_v45 = vadd.f32 %v243_v20, %v2892_v57 }
 0x112   :  { %v246_v36 = vadd.f32 %v245_v31, %v2888_v55  ;;  %v247_v37 = vpop.f32.mrb[19].mxu0  ;;  %1439 = vmatmul.mubr.bf16.gmra.mrb[36].mxu0 %v437_v21  ;;  %1659 = vmatmul.mubr.bf16.gmra.mrb[68].mxu1 %v437_v21  ;;  %v3002_v40 = vadd.f32 %v338_v34, %v2940_v44  ;;  %v340_v41 = vpop.f32.mrb[19].mxu1 }
 0x113   :  { %v248_v48 = vadd.f32 %v247_v37, %v2892_v57  ;;  %1502 = vmatpush1.bf16.msra.mxu0 %v2550_v16  ;;  %2304 = vmatpush3.bf16.msra.mxu1 %v2577_v17  ;;  %v3007_v56 = vadd.f32 %v340_v41, %v2945_v47  ;;  %v2564_v17 = vld [vmem:[#allocation3 + $0x25c] ss:$12 sps:$4 sm:$0xff]  }
 0x114   :  { %v409_v58 = vpack.c.bf16 %v246_v36, %v242_v35  ;;  %1503 = vmatprep.subr.bf16.mxu0 %v2556_v24  ;;  %2305 = vmatprep.subr.bf16.mxu1 %v2581_v28  ;;  %v403_v61 = vpack.c.bf16 %v3002_v40, %v2994_v29 }
 0x115   :  { %v410_v62 = vpack.c.bf16 %v248_v48, %v244_v45  ;;  %v404_v2 = vpack.c.bf16 %v3007_v56, %v2997_v32  ;;  %v2562_v45 = vld [vmem:[#allocation3 + $0x258] ss:$12 sps:$4 sm:$0xff]  }
 0x116   :  { %v441_v16 = vmax.bf16 %v2616_v0, %v409_v58  ;;  %v435_v38 = vmax.bf16 %v2616_v0, %v403_v61 }
 0x117   :  { %v251_v4 = vpop.f32.mrb[20].mxu0  ;;  %1504 = vmatpush1.bf16.msra.mxu0 %v2554_v49  ;;  %v442_v6 = vmax.bf16 %v2616_v0, %v410_v62  ;;  %2306 = vmatpush3.bf16.msra.mxu1 %v2585_v50  ;;  %v344_v14 = vpop.f32.mrb[20].mxu1  ;;  %v2568_v50 = vld [vmem:[#allocation3 + $0x274] ss:$12 sps:$4 sm:$0xff]  }
 0x118   :  { %v253_v15 = vpop.f32.mrb[21].mxu0  ;;  %1505 = vmatprep.subr.bf16.mxu0 %v2560_v59  ;;  %v3016_v19 = vadd.f32 %v344_v14, %v2940_v44  ;;  %v346_v20 = vpop.f32.mrb[21].mxu1  ;;  %v252_v30 = vadd.f32 %v251_v4, %v2888_v55  ;;  %v2566_v4 = vld [vmem:[#allocation3 + $0x270] ss:$12 sps:$4 sm:$0xff]   ;;  %v2572_v14 = vld [vmem:[#allocation3 + $0x28c] ss:$12 sps:$4 sm:$0xff]  }
 0x119   :  { %v255_v21 = vpop.f32.mrb[22].mxu0  ;;  %1448 = vmatprep.mubr.bf16.mxu0 %v442_v6  ;;  %1666 = vmatprep.mubr.bf16.mxu1 %v442_v6  ;;  %v3019_v24 = vadd.f32 %v346_v20, %v2945_v47  ;;  %v348_v28 = vpop.f32.mrb[22].mxu1  ;;  %v254_v37 = vadd.f32 %v253_v15, %v2892_v57 }
 0x11a   :  { %v256_v31 = vadd.f32 %v255_v21, %v2888_v55  ;;  %v257_v34 = vpop.f32.mrb[23].mxu0  ;;  %1449 = vmatmul.mubr.bf16.gmra.mrb[40].mxu0 %v441_v16  ;;  %1667 = vmatmul.mubr.bf16.gmra.mrb[72].mxu1 %v441_v16  ;;  %v3024_v35 = vadd.f32 %v348_v28, %v2940_v44  ;;  %v350_v36 = vpop.f32.mrb[23].mxu1  ;;  %v2576_v28 = vld [vmem:[#allocation3 + $0x2a4] ss:$12 sps:$4 sm:$0xff]  }
 0x11b   :  { %v258_v41 = vadd.f32 %v257_v34, %v2892_v57  ;;  %1506 = vmatpush1.bf16.msra.mxu0 %v2558_v8  ;;  %v3029_v48 = vadd.f32 %v350_v36, %v2945_v47  ;;  %v450_v57 = vmax.bf16 %v2616_v0, %v418_v13  ;;  %v2570_v13 = vld [vmem:[#allocation3 + $0x288] ss:$12 sps:$4 sm:$0xff]   ;;  %v2574_v34 = vld [vmem:[#allocation3 + $0x2a0] ss:$12 sps:$4 sm:$0xff]   ;;  %v454_v36 = vmax.bf16 %v2616_v0, %v422_v46 }
 0x11c   :  { %v413_v49 = vpack.c.bf16 %v256_v31, %v252_v30  ;;  %1507 = vmatprep.subr.bf16.mxu0 %v2564_v17  ;;  %v407_v55 = vpack.c.bf16 %v3024_v35, %v3016_v19 }
 0x11d   :  { %v414_v58 = vpack.c.bf16 %v258_v41, %v254_v37  ;;  %v408_v59 = vpack.c.bf16 %v3029_v48, %v3019_v24  ;;  %v449_v41 = vmax.bf16 %v2616_v0, %v417_v11  ;;  %v2584_v11 = vld [vmem:[#allocation3 + $0x2d4] ss:$12 sps:$4 sm:$0xff]  }
 0x11e   :  { %v445_v8 = vmax.bf16 %v2616_v0, %v413_v49  ;;  %v439_v29 = vmax.bf16 %v2616_v0, %v407_v55 }
 0x11f   :  { %1508 = vmatpush1.bf16.msra.mxu0 %v2562_v45  ;;  %v446_v62 = vmax.bf16 %v2616_v0, %v414_v58  ;;  %v354_v6 = vpop.f32.mrb[24].mxu1  ;;  %v2580_v45 = vld [vmem:[#allocation3 + $0x2bc] ss:$12 sps:$4 sm:$0xff]   ;;  %v440_v32 = vmax.bf16 %v2616_v0, %v408_v59 }
 0x120   :  { %1509 = vmatprep.subr.bf16.mxu0 %v2568_v50  ;;  %v3042_v15 = vadd.f32 %v354_v6, %v2940_v44  ;;  %v356_v16 = vpop.f32.mrb[25].mxu1  ;;  %v428_v6 = vmax.bf16 %v2616_v0, %v396_v26 }
 0x121   :  { %1458 = vmatprep.mubr.bf16.mxu0 %v446_v62  ;;  %1674 = vmatprep.mubr.bf16.mxu1 %v446_v62  ;;  %v3045_v17 = vadd.f32 %v356_v16, %v2945_v47  ;;  %v358_v20 = vpop.f32.mrb[26].mxu1  ;;  %v2588_v16 = vld [vmem:[#allocation3 + $0x2ec] ss:$12 sps:$4 sm:$0xff]  }
 0x122   :  { %1459 = vmatmul.mubr.bf16.gmra.mrb[44].mxu0 %v445_v8  ;;  %1675 = vmatmul.mubr.bf16.gmra.mrb[76].mxu1 %v445_v8  ;;  %v3048_v63 = vadd.f32 %v358_v20, %v2940_v44  ;;  %v360_v9 = vpop.f32.mrb[27].mxu1 }
 0x123   :  { %1510 = vmatpush1.bf16.msra.mxu0 %v2566_v4  ;;  %1468 = vmatprep.mubr.bf16.mxu0 %v450_v57  ;;  %v3051_v21 = vadd.f32 %v360_v9, %v2945_v47 }
 0x124   :  { %1511 = vmatprep.subr.bf16.mxu0 %v2572_v14  ;;  %1682 = vmatprep.mubr.bf16.mxu1 %v450_v57  ;;  %v411_v30 = vpack.c.bf16 %v3048_v63, %v3042_v15  ;;  %v2582_v57 = vld [vmem:[#allocation3 + $0x2d0] ss:$12 sps:$4 sm:$0xff]   ;;  %v453_v14 = vmax.bf16 %v2616_v0, %v421_v43 }
 0x125   :  { %v412_v31 = vpack.c.bf16 %v3051_v21, %v3045_v17 }
 0x126   :  { %v443_v19 = vmax.bf16 %v2616_v0, %v411_v30 }
 0x127   :  { %1512 = vmatpush1.bf16.msra.mxu0 %v2570_v13  ;;  %v364_v37 = vpop.f32.mrb[28].mxu1  ;;  %v444_v24 = vmax.bf16 %v2616_v0, %v412_v31 }
 0x128   :  { %1513 = vmatprep.subr.bf16.mxu0 %v2576_v28  ;;  %v3066_v49 = vadd.f32 %v364_v37, %v2940_v44  ;;  %v366_v50 = vpop.f32.mrb[29].mxu1  ;;  %v427_v37 = vmax.bf16 %v2616_v0, %v395_v22  ;;  %v436_v22 = vmax.bf16 %v2616_v0, %v404_v2 }
 0x129   :  { %v3069_v58 = vadd.f32 %v366_v50, %v2945_v47  ;;  %v368_v62 = vpop.f32.mrb[30].mxu1 }
 0x12a   :  { %1469 = vmatmul.mubr.bf16.gmra.mrb[48].mxu0 %v449_v41  ;;  %1683 = vmatmul.mubr.bf16.gmra.mrb[80].mxu1 %v449_v41  ;;  %v3072_v27 = vadd.f32 %v368_v62, %v2940_v44  ;;  %v370_v39 = vpop.f32.mrb[31].mxu1 }
 0x12b   :  { %1514 = vmatpush1.bf16.msra.mxu0 %v2574_v34  ;;  %1478 = vmatprep.mubr.bf16.mxu0 %v454_v36  ;;  %v3075_v5 = vadd.f32 %v370_v39, %v2945_v47  ;;  %v432_v34 = vmax.bf16 %v2616_v0, %v400_v12 }
 0x12c   :  { %1515 = vmatprep.subr.bf16.mxu0 %v2580_v45  ;;  %1690 = vmatprep.mubr.bf16.mxu1 %v454_v36  ;;  %v415_v46 = vpack.c.bf16 %v3072_v27, %v3066_v49 }
 0x12d   :  { %v416_v4 = vpack.c.bf16 %v3075_v5, %v3069_v58 }
 0x12e   :  { %v447_v5 = vmax.bf16 %v2616_v0, %v415_v46 }
 0x12f   :  { %1516 = vmatpush1.bf16.msra.mxu0 %v2578_v60  ;;  %v374_v8 = vpop.f32.mrb[32].mxu1  ;;  %v448_v17 = vmax.bf16 %v2616_v0, %v416_v4 }
 0x130   :  { %1517 = vmatprep.subr.bf16.mxu0 %v2584_v11  ;;  %v3090_v20 = vadd.f32 %v374_v8, %v2940_v44  ;;  %v376_v9 = vpop.f32.mrb[33].mxu1 }
 0x131   :  { %v3093_v13 = vadd.f32 %v376_v9, %v2945_v47  ;;  %v378_v28 = vpop.f32.mrb[34].mxu1 }
 0x132   :  { %1479 = vmatmul.mubr.bf16.gmra.mrb[52].mxu0 %v453_v14  ;;  %1691 = vmatmul.mubr.bf16.gmra.mrb[84].mxu1 %v453_v14  ;;  %v3096_v3 = vadd.f32 %v378_v28, %v2940_v44  ;;  %v380_v18 = vpop.f32.mrb[35].mxu1 }
 0x133   :  { %1518 = vmatpush1.bf16.msra.mxu0 %v2582_v57  ;;  %1521 = vmatprep.mubr.bf16.mxu0 %v428_v6  ;;  %v3099_v33 = vadd.f32 %v380_v18, %v2945_v47 }
 0x134   :  { %1519 = vmatprep.subr.bf16.mxu0 %v2588_v16  ;;  %1731 = vmatprep.mubr.bf16.mxu1 %v428_v6  ;;  %v419_v43 = vpack.c.bf16 %v3096_v3, %v3090_v20 }
 0x135   :  { %v420_v26 = vpack.c.bf16 %v3099_v33, %v3093_v13 }
 0x136   :  { %v451_v63 = vmax.bf16 %v2616_v0, %v419_v43 }
 0x137   :  { %1520 = vmatpush1.bf16.msra.mxu0 %v2586_v23  ;;  %v384_v36 = vpop.f32.mrb[36].mxu1  ;;  %v452_v58 = vmax.bf16 %v2616_v0, %v420_v26 }
 0x138   :  { %v3114_v41 = vadd.f32 %v384_v36, %v2940_v44  ;;  %v386_v45 = vpop.f32.mrb[37].mxu1 }
 0x139   :  { %v387_v50 = vadd.f32 %v386_v45, %v2945_v47  ;;  %v388_v62 = vpop.f32.mrb[38].mxu1 }
 0x13a   :  { %1522 = vmatmul.mubr.bf16.vlgmr.msra.gmra.mrb[24].mxu0 %v427_v37  ;;  %1732 = vmatmul.mubr.bf16.vlgmr.msra.gmra.mrb[88].mxu1 %v427_v37  ;;  %v389_v39 = vadd.f32 %v388_v62, %v2940_v44  ;;  %v390_v42 = vpop.f32.mrb[39].mxu1  ;;  %v431_v44 = vmax.bf16 %v2616_v0, %v399_v7 }
 0x13b   :  { %1531 = vmatprep.mubr.bf16.mxu0 %v432_v34  ;;  %1739 = vmatprep.mubr.bf16.mxu1 %v432_v34  ;;  %v391_v53 = vadd.f32 %v390_v42, %v2945_v47 }
 0x13c   :  { %v423_v1 = vpack.c.bf16 %v389_v39, %v3114_v41 }
 0x13d   :  { %v424_v10 = vpack.c.bf16 %v391_v53, %v387_v50 }
 0x13e   :  { %v455_v30 = vmax.bf16 %v2616_v0, %v423_v1 }
 0x13f   :  { %v3124_v12 = vpop.f32.mrb[40].mxu1  ;;  %v456_v15 = vmax.bf16 %v2616_v0, %v424_v10 }
 0x140   :  { %v801_v60 = vpop.f32.mrb[41].mxu1 }
 0x141   :  { %v3130_v11 = vpop.f32.mrb[42].mxu1 }
 0x142   :  { %1532 = vmatmul.mubr.bf16.gmra.mrb[28].mxu0 %v431_v44  ;;  %1740 = vmatmul.mubr.bf16.gmra.mrb[92].mxu1 %v431_v44  ;;  %v804_v47 = vpop.f32.mrb[43].mxu1 }
 0x143   :  { %1541 = vmatprep.mubr.bf16.mxu0 %v436_v22  ;;  %1747 = vmatprep.mubr.bf16.mxu1 %v436_v22 }
 0x147   :  { %v3136_v56 = vpop.f32.mrb[44].mxu1 }
 0x148   :  { %v3142_v51 = vpop.f32.mrb[45].mxu1 }
 0x149   :  { %v3144_v7 = vpop.f32.mrb[46].mxu1 }
 0x14a   :  { %1542 = vmatmul.mubr.bf16.gmra.mrb[32].mxu0 %v435_v38  ;;  %1748 = vmatmul.mubr.bf16.gmra.mrb[96].mxu1 %v435_v38  ;;  %v820_v2 = vpop.f32.mrb[47].mxu1 }
 0x14b   :  { %1551 = vmatprep.mubr.bf16.mxu0 %v440_v32  ;;  %1755 = vmatprep.mubr.bf16.mxu1 %v440_v32 }
 0x14f   :  { %v3150_v48 = vpop.f32.mrb[48].mxu1 }
 0x150   :  { %v3156_v40 = vpop.f32.mrb[49].mxu1 }
 0x151   :  { %v3158_v61 = vpop.f32.mrb[50].mxu1 }
 0x152   :  { %1552 = vmatmul.mubr.bf16.gmra.mrb[36].mxu0 %v439_v29  ;;  %1756 = vmatmul.mubr.bf16.gmra.mrb[100].mxu1 %v439_v29  ;;  %v3160_v59 = vpop.f32.mrb[51].mxu1 }
 0x153   :  { %1561 = vmatprep.mubr.bf16.mxu0 %v444_v24  ;;  %1763 = vmatprep.mubr.bf16.mxu1 %v444_v24 }
 0x157   :  { %v3166_v21 = vpop.f32.mrb[52].mxu1 }
 0x158   :  { %v3172_v35 = vpop.f32.mrb[53].mxu1 }
 0x159   :  { %v3174_v55 = vpop.f32.mrb[54].mxu1 }
 0x15a   :  { %1562 = vmatmul.mubr.bf16.gmra.mrb[40].mxu0 %v443_v19  ;;  %1764 = vmatmul.mubr.bf16.gmra.mrb[104].mxu1 %v443_v19  ;;  %v3176_v31 = vpop.f32.mrb[55].mxu1 }
 0x15b   :  { %1571 = vmatprep.mubr.bf16.mxu0 %v448_v17  ;;  %1771 = vmatprep.mubr.bf16.mxu1 %v448_v17 }
 0x162   :  { %1572 = vmatmul.mubr.bf16.gmra.mrb[44].mxu0 %v447_v5  ;;  %1772 = vmatmul.mubr.bf16.gmra.mrb[108].mxu1 %v447_v5 }
 0x163   :  { %1581 = vmatprep.mubr.bf16.mxu0 %v452_v58  ;;  %1779 = vmatprep.mubr.bf16.mxu1 %v452_v58 }
 0x16a   :  { %1582 = vmatmul.mubr.bf16.gmra.mrb[48].mxu0 %v451_v63  ;;  %1780 = vmatmul.mubr.bf16.gmra.mrb[112].mxu1 %v451_v63 }
 0x16b   :  { %1591 = vmatprep.mubr.bf16.mxu0 %v456_v15  ;;  %1787 = vmatprep.mubr.bf16.mxu1 %v456_v15 }
 0x172   :  { %1592 = vmatmul.mubr.bf16.gmra.mrb[52].mxu0 %v455_v30  ;;  %1788 = vmatmul.mubr.bf16.gmra.mrb[116].mxu1 %v455_v30 }
 0x1cd   :  { %v2243_v49 = vpop.f32.mrb[56].mxu1 }
 0x1ce   :  { %v2244_v27 = vpop.f32.mrb[57].mxu1 }
 0x1cf   :  { %v2245_v46 = vadd.f32 %v2244_v27, %v2243_v49  ;;  %v2246_v4 = vpop.f32.mrb[58].mxu1 }
 0x1d0   :  { %v2247_v57 = vpop.f32.mrb[59].mxu1 }
 0x1d1   :  { %v3189_v6 = vadd.f32 %v2245_v46, %v801_v60  ;;  %v2248_v8 = vadd.f32 %v2247_v57, %v2246_v4 }
 0x1d3   :  { %v3191_v14 = vadd.f32 %v2248_v8, %v804_v47 }
 0x1d5   :  { %v2249_v16 = vpop.f32.mrb[60].mxu1 }
 0x1d6   :  { %v2250_v20 = vpop.f32.mrb[61].mxu1 }
 0x1d7   :  { %v2251_v9 = vadd.f32 %v2250_v20, %v2249_v16  ;;  %v2252_v13 = vpop.f32.mrb[62].mxu1 }
 0x1d8   :  { %v2253_v28 = vpop.f32.mrb[63].mxu1 }
 0x1d9   :  { %v3194_v3 = vadd.f32 %v3124_v12, %v2251_v9  ;;  %v2254_v0 = vadd.f32 %v2253_v28, %v2252_v13 }
 0x1db   :  { %v3197_v18 = vadd.f32 %v3130_v11, %v2254_v0 }
 0x1dd   :  { %v2255_v23 = vpop.f32.mrb[64].mxu1 }
 0x1de   :  { %v2256_v33 = vpop.f32.mrb[65].mxu1 }
 0x1df   :  { %v2257_v43 = vadd.f32 %v2256_v33, %v2255_v23  ;;  %v2258_v26 = vpop.f32.mrb[66].mxu1 }
 0x1e0   :  { %v2259_v34 = vpop.f32.mrb[67].mxu1 }
 0x1e1   :  { %v3200_v36 = vadd.f32 %v2257_v43, %v3142_v51  ;;  %v2260_v37 = vadd.f32 %v2259_v34, %v2258_v26 }
 0x1e3   :  { %v3202_v41 = vadd.f32 %v2260_v37, %v820_v2 }
 0x1e5   :  { %v2261_v45 = vpop.f32.mrb[68].mxu1 }
 0x1e6   :  { %v2262_v50 = vpop.f32.mrb[69].mxu1 }
 0x1e7   :  { %v2263_v62 = vadd.f32 %v2262_v50, %v2261_v45  ;;  %v2264_v39 = vpop.f32.mrb[70].mxu1 }
 0x1e8   :  { %v2265_v42 = vpop.f32.mrb[71].mxu1 }
 0x1e9   :  { %v3205_v53 = vadd.f32 %v3136_v56, %v2263_v62  ;;  %v2266_v1 = vadd.f32 %v2265_v42, %v2264_v39 }
 0x1eb   :  { %v3208_v10 = vadd.f32 %v3144_v7, %v2266_v1 }
 0x1ed   :  { %v2267_v22 = vpop.f32.mrb[72].mxu1 }
 0x1ee   :  { %v2268_v12 = vpop.f32.mrb[73].mxu1 }
 0x1ef   :  { %v2269_v44 = vadd.f32 %v2268_v12, %v2267_v22  ;;  %v2270_v60 = vpop.f32.mrb[74].mxu1 }
 0x1f0   :  { %v2271_v11 = vpop.f32.mrb[75].mxu1 }
 0x1f1   :  { %v3211_v47 = vadd.f32 %v2269_v44, %v3156_v40  ;;  %v2272_v32 = vadd.f32 %v2271_v11, %v2270_v60 }
 0x1f3   :  { %v3214_v38 = vadd.f32 %v2272_v32, %v3160_v59 }
 0x1f5   :  { %v2273_v51 = vpop.f32.mrb[76].mxu1 }
 0x1f6   :  { %v2274_v2 = vpop.f32.mrb[77].mxu1 }
 0x1f7   :  { %v2275_v56 = vadd.f32 %v2274_v2, %v2273_v51  ;;  %v2276_v24 = vpop.f32.mrb[78].mxu1 }
 0x1f8   :  { %v2277_v29 = vpop.f32.mrb[79].mxu1 }
 0x1f9   :  { %v3217_v7 = vadd.f32 %v3150_v48, %v2275_v56  ;;  %v2278_v17 = vadd.f32 %v2277_v29, %v2276_v24 }
 0x1fb   :  { %v3220_v19 = vadd.f32 %v3158_v61, %v2278_v17  ;;  %v1796_v61 = vld [vmem:[%s3443_s6] sm:$0x7] }
 0x1fc   :  { %v3244_v9 = vrot.slane %v1796_v61, %v2884_v54  ;;  %v3255_v45 = vrot.slane %v1796_v61, %v2920_v25 }
 0x1fd   :  { %v2279_v58 = vpop.f32.mrb[80].mxu1 }
 0x1fe   :  { %v2280_v5 = vpop.f32.mrb[81].mxu1 }
 0x1ff   :  { %v2281_v40 = vadd.f32 %v2280_v5, %v2279_v58  ;;  %v2282_v15 = vpop.f32.mrb[82].mxu1 }
 0x200   :  { %v2283_v63 = vpop.f32.mrb[83].mxu1 }
 0x201   :  { %v3223_v59 = vadd.f32 %v2281_v40, %v3172_v35  ;;  %v2284_v30 = vadd.f32 %v2283_v63, %v2282_v15  ;;  %v3235_v35 = vrot.slane %v1796_v61, %v2876_v52 }
 0x203   :  { %v3226_v49 = vadd.f32 %v2284_v30, %v3176_v31  ;;  %v1909_v31 = vld [vmem:[%s3444_s7] sm:$0x7] }
 0x204   :  { %v3262_v60 = vrot.slane %v1909_v31, %v2920_v25 }
 0x205   :  { %v2285_v27 = vpop.f32.mrb[84].mxu1 }
 0x206   :  { %v2286_v46 = vpop.f32.mrb[85].mxu1 }
 0x207   :  { %v2287_v48 = vadd.f32 %v2286_v46, %v2285_v27  ;;  %v2288_v4 = vpop.f32.mrb[86].mxu1 }
 0x208   :  { %v2289_v57 = vpop.f32.mrb[87].mxu1 }
 0x209   :  { %v3232_v8 = vadd.f32 %v3166_v21, %v2287_v48  ;;  %v2290_v16 = vadd.f32 %v2289_v57, %v2288_v4  ;;  %v3248_v21 = vrot.slane %v1909_v31, %v2876_v52 }
 0x20b   :  { %v3238_v20 = vadd.f32 %v3174_v55, %v2290_v16  ;;  %v3252_v55 = vrot.slane %v1909_v31, %v2884_v54 }
 0x20d   :  { %v1523_v13 = vpop.f32.mrb[24].mxu0  ;;  %v2307_v28 = vpop.f32.mrb[88].mxu1 }
 0x20e   :  { %v1813_v0 = vadd.f32 %v3235_v35, %v1523_v13  ;;  %v1525_v23 = vpop.f32.mrb[25].mxu0  ;;  %v2308_v33 = vpop.f32.mrb[89].mxu1 }
 0x20f   :  { %v1814_v43 = vadd.f32 %v3244_v9, %v1525_v23  ;;  %v2309_v26 = vadd.f32 %v2308_v33, %v2307_v28  ;;  %v1527_v34 = vpop.f32.mrb[26].mxu0  ;;  %v2310_v37 = vpop.f32.mrb[90].mxu1 }
 0x210   :  { %v1861_v50 = vmax.f32 %v1813_v0, 0.0  ;;  %v1816_v62 = vadd.f32 %v3235_v35, %v1527_v34  ;;  %v1529_v39 = vpop.f32.mrb[27].mxu0  ;;  %v2311_v42 = vpop.f32.mrb[91].mxu1 }
 0x211   :  { %v1862_v52 = vmax.f32 %v1814_v43, 0.0  ;;  %v1734_v1 = vadd.f32 %v2309_v26, %v3189_v6  ;;  %v1817_v22 = vadd.f32 %v3244_v9, %v1529_v39  ;;  %v2312_v12 = vadd.f32 %v2311_v42, %v2310_v37 }
 0x212   :  { %v1926_v54 = vmul.f32 %v3248_v21, %v1861_v50  ;;  %v1864_v44 = vmax.f32 %v1816_v62, 0.0 }
 0x213   :  { %v1927_v11 = vmul.f32 %v3252_v55, %v1862_v52  ;;  %v1865_v32 = vmax.f32 %v1817_v22, 0.0  ;;  %v1737_v51 = vadd.f32 %v2312_v12, %v3191_v14  ;;  %v1815_v2 = vadd.f32 %v3255_v45, %v1734_v1 }
 0x214   :  { %v1929_v56 = vmul.f32 %v3248_v21, %v1864_v44 }
 0x215   :  { %v1930_v6 = vmul.f32 %v3252_v55, %v1865_v32  ;;  %v1818_v24 = vadd.f32 %v3255_v45, %v1737_v51  ;;  %v1533_v29 = vpop.f32.mrb[28].mxu0  ;;  %v2313_v17 = vpop.f32.mrb[92].mxu1  ;;  %v1863_v58 = vmax.f32 %v1815_v2, 0.0  ;;  %v1974_v5 = vadd.f32 %v1927_v11, %v1926_v54 }
 0x216   :  { %v1819_v25 = vadd.f32 %v3235_v35, %v1533_v29  ;;  %v1535_v40 = vpop.f32.mrb[29].mxu0  ;;  %v2314_v15 = vpop.f32.mrb[93].mxu1 }
 0x217   :  { %v1866_v63 = vmax.f32 %v1818_v24, 0.0  ;;  %v1820_v30 = vadd.f32 %v3244_v9, %v1535_v40  ;;  %v2315_v14 = vadd.f32 %v2314_v15, %v2313_v17  ;;  %v1537_v27 = vpop.f32.mrb[30].mxu0  ;;  %v2316_v46 = vpop.f32.mrb[94].mxu1  ;;  %v1928_v48 = vmul.f32 %v3262_v60, %v1863_v58 }
 0x218   :  { %v1867_v4 = vmax.f32 %v1819_v25, 0.0  ;;  %v1822_v61 = vadd.f32 %v3235_v35, %v1537_v27  ;;  %v1539_v57 = vpop.f32.mrb[31].mxu0  ;;  %v2317_v16 = vpop.f32.mrb[95].mxu1  ;;  %v1978_v31 = vadd.f32 %v1930_v6, %v1929_v56 }
 0x219   :  { %v1868_v13 = vmax.f32 %v1820_v30, 0.0  ;;  %v1742_v28 = vadd.f32 %v2315_v14, %v3194_v3  ;;  %v1823_v0 = vadd.f32 %v3244_v9, %v1539_v57  ;;  %v2318_v23 = vadd.f32 %v2317_v16, %v2316_v46 }
 0x21a   :  { %v1932_v33 = vmul.f32 %v3248_v21, %v1867_v4  ;;  %v1870_v43 = vmax.f32 %v1822_v61, 0.0  ;;  %v1975_v26 = vadd.f32 %v1974_v5, %v1928_v48  ;;  %v1931_v34 = vmul.f32 %v3262_v60, %v1866_v63 }
 0x21b   :  { %v1933_v37 = vmul.f32 %v3252_v55, %v1868_v13  ;;  %v1871_v50 = vmax.f32 %v1823_v0, 0.0  ;;  %v1745_v62 = vadd.f32 %v2318_v23, %v3197_v18  ;;  %v1821_v39 = vadd.f32 %v3255_v45, %v1742_v28 }
 0x21c   :  { %v1935_v42 = vmul.f32 %v3248_v21, %v1870_v43  ;;  %1976 = vadd.xlane.f32.xlu0 %v1975_v26  ;;  %v1979_v3 = vadd.f32 %v1978_v31, %v1931_v34 }
 0x21d   :  { %v1936_v52 = vmul.f32 %v3252_v55, %v1871_v50  ;;  %v1824_v1 = vadd.f32 %v3255_v45, %v1745_v62  ;;  %v1543_v22 = vpop.f32.mrb[32].mxu0  ;;  %v2319_v12 = vpop.f32.mrb[96].mxu1  ;;  %v1869_v54 = vmax.f32 %v1821_v39, 0.0  ;;  %v1982_v44 = vadd.f32 %v1933_v37, %v1932_v33 }
 0x21e   :  { %v1825_v11 = vadd.f32 %v3235_v35, %v1543_v22  ;;  %v1545_v32 = vpop.f32.mrb[33].mxu0  ;;  %v2320_v51 = vpop.f32.mrb[97].mxu1 }
 0x21f   :  { %v1872_v2 = vmax.f32 %v1824_v1, 0.0  ;;  %v1826_v18 = vadd.f32 %v3244_v9, %v1545_v32  ;;  %v2321_v56 = vadd.f32 %v2320_v51, %v2319_v12  ;;  %v2322_v6 = vpop.f32.mrb[98].mxu1  ;;  %v1547_v24 = vpop.f32.mrb[34].mxu0  ;;  %v1934_v29 = vmul.f32 %v3262_v60, %v1869_v54 }
 0x220   :  { %v1873_v17 = vmax.f32 %v1825_v11, 0.0  ;;  %1980 = vadd.xlane.f32.xlu0 %v1979_v3  ;;  %v1828_v58 = vadd.f32 %v3235_v35, %v1547_v24  ;;  %v1549_v5 = vpop.f32.mrb[35].mxu0  ;;  %v2323_v25 = vpop.f32.mrb[99].mxu1  ;;  %v1986_v40 = vadd.f32 %v1936_v52, %v1935_v42 }
 0x221   :  { %v1874_v15 = vmax.f32 %v1826_v18, 0.0  ;;  %v1750_v63 = vadd.f32 %v2321_v56, %v3200_v36  ;;  %v1829_v30 = vadd.f32 %v3244_v9, %v1549_v5  ;;  %v2324_v14 = vadd.f32 %v2323_v25, %v2322_v6 }
 0x222   :  { %v1938_v27 = vmul.f32 %v3248_v21, %v1873_v17  ;;  %v1876_v46 = vmax.f32 %v1828_v58, 0.0  ;;  %v1983_v48 = vadd.f32 %v1982_v44, %v1934_v29  ;;  %v1937_v4 = vmul.f32 %v3262_v60, %v1872_v2 }
 0x223   :  { %v1939_v61 = vmul.f32 %v3252_v55, %v1874_v15  ;;  %v1827_v57 = vadd.f32 %v3255_v45, %v1750_v63  ;;  %v1877_v16 = vmax.f32 %v1829_v30, 0.0  ;;  %v1753_v31 = vadd.f32 %v2324_v14, %v3202_v41 }
 0x224   :  { %v1941_v13 = vmul.f32 %v3248_v21, %v1876_v46  ;;  %1984 = vadd.xlane.f32.xlu1 %v1983_v48  ;;  %v1987_v36 = vadd.f32 %v1986_v40, %v1937_v4 }
 0x225   :  { %v1875_v28 = vmax.f32 %v1827_v57, 0.0  ;;  %v1942_v0 = vmul.f32 %v3252_v55, %v1877_v16  ;;  %v1830_v23 = vadd.f32 %v3255_v45, %v1753_v31  ;;  %v1553_v33 = vpop.f32.mrb[36].mxu0  ;;  %v2325_v43 = vpop.f32.mrb[100].mxu1  ;;  %v1990_v26 = vadd.f32 %v1939_v61, %v1938_v27 }
 0x226   :  { %v1831_v34 = vadd.f32 %v3235_v35, %v1553_v33  ;;  %v1555_v37 = vpop.f32.mrb[37].mxu0  ;;  %v2326_v50 = vpop.f32.mrb[101].mxu1 }
 0x227   :  { %v1878_v62 = vmax.f32 %v1830_v23, 0.0  ;;  %v1832_v39 = vadd.f32 %v3244_v9, %v1555_v37  ;;  %v2327_v41 = vadd.f32 %v2326_v50, %v2325_v43  ;;  %v2328_v42 = vpop.f32.mrb[102].mxu1  ;;  %v1557_v3 = vpop.f32.mrb[38].mxu0  ;;  %v1940_v52 = vmul.f32 %v3262_v60, %v1875_v28 }
 0x228   :  { %v1879_v1 = vmax.f32 %v1831_v34, 0.0  ;;  %1988 = vadd.xlane.f32.xlu1 %v1987_v36  ;;  %v1834_v22 = vadd.f32 %v3235_v35, %v1557_v3  ;;  %v1559_v12 = vpop.f32.mrb[39].mxu0  ;;  %v2329_v54 = vpop.f32.mrb[103].mxu1  ;;  %v1994_v44 = vadd.f32 %v1942_v0, %v1941_v13 }
 0x229   :  { %v1880_v11 = vmax.f32 %v1832_v39, 0.0  ;;  %v1758_v32 = vadd.f32 %v2327_v41, %v3205_v53  ;;  %v1835_v51 = vadd.f32 %v3244_v9, %v1559_v12  ;;  %v2330_v2 = vadd.f32 %v2329_v54, %v2328_v42 }
 0x22a   :  { %v1944_v18 = vmul.f32 %v3248_v21, %v1879_v1  ;;  %v1882_v56 = vmax.f32 %v1834_v22, 0.0  ;;  %v1991_v6 = vadd.f32 %v1990_v26, %v1940_v52  ;;  %v1943_v24 = vmul.f32 %v3262_v60, %v1878_v62 }
 0x22b   :  { %v1945_v29 = vmul.f32 %v3252_v55, %v1880_v11  ;;  %v1833_v17 = vadd.f32 %v3255_v45, %v1758_v32  ;;  %v1883_v58 = vmax.f32 %v1835_v51, 0.0  ;;  %v1761_v5 = vadd.f32 %v2330_v2, %v3208_v10 }
 0x22c   :  { %v1947_v25 = vmul.f32 %v3248_v21, %v1882_v56  ;;  %1992 = vadd.xlane.f32.xlu0 %v1991_v6  ;;  %v1995_v53 = vadd.f32 %v1994_v44, %v1943_v24 }
 0x22d   :  { %v1881_v40 = vmax.f32 %v1833_v17, 0.0  ;;  %v1948_v15 = vmul.f32 %v3252_v55, %v1883_v58  ;;  %v1836_v63 = vadd.f32 %v3255_v45, %v1761_v5  ;;  %v2331_v30 = vpop.f32.mrb[104].mxu1  ;;  %v1563_v14 = vpop.f32.mrb[40].mxu0  ;;  %v1998_v27 = vadd.f32 %v1945_v29, %v1944_v18 }
 0x22e   :  { %1996 = vadd.xlane.f32.xlu1 %v1995_v53  ;;  %v1837_v46 = vadd.f32 %v3235_v35, %v1563_v14  ;;  %v1565_v48 = vpop.f32.mrb[41].mxu0  ;;  %v2332_v4 = vpop.f32.mrb[105].mxu1 }
 0x22f   :  { %v1884_v61 = vmax.f32 %v1836_v63, 0.0  ;;  %v1838_v10 = vadd.f32 %v3244_v9, %v1565_v48  ;;  %v2333_v57 = vadd.f32 %v2332_v4, %v2331_v30  ;;  %v1567_v16 = vpop.f32.mrb[42].mxu0  ;;  %v2334_v31 = vpop.f32.mrb[106].mxu1  ;;  %v1946_v13 = vmul.f32 %v3262_v60, %v1881_v40 }
 0x230   :  { %v1885_v36 = vmax.f32 %v1837_v46, 0.0  ;;  %v1840_v28 = vadd.f32 %v3235_v35, %v1567_v16  ;;  %v1569_v0 = vpop.f32.mrb[43].mxu0  ;;  %v2335_v23 = vpop.f32.mrb[107].mxu1  ;;  %v2002_v33 = vadd.f32 %v1948_v15, %v1947_v25 }
 0x231   :  { %v1886_v43 = vmax.f32 %v1838_v10, 0.0  ;;  %v1766_v26 = vadd.f32 %v2333_v57, %v3211_v47  ;;  %v1841_v34 = vadd.f32 %v3244_v9, %v1569_v0  ;;  %v2336_v37 = vadd.f32 %v2335_v23, %v2334_v31 }
 0x232   :  { %v1950_v50 = vmul.f32 %v3248_v21, %v1885_v36  ;;  %v1888_v62 = vmax.f32 %v1840_v28, 0.0  ;;  %v1999_v39 = vadd.f32 %v1998_v27, %v1946_v13  ;;  %v1949_v41 = vmul.f32 %v3262_v60, %v1884_v61 }
 0x233   :  { %v1951_v42 = vmul.f32 %v3252_v55, %v1886_v43  ;;  %v1839_v3 = vadd.f32 %v3255_v45, %v1766_v26  ;;  %v1889_v52 = vmax.f32 %v1841_v34, 0.0  ;;  %v1769_v1 = vadd.f32 %v2336_v37, %v3214_v38 }
 0x234   :  { %v1953_v22 = vmul.f32 %v3248_v21, %v1888_v62  ;;  %2000 = vadd.xlane.f32.xlu0 %v1999_v39  ;;  %v2003_v47 = vadd.f32 %v2002_v33, %v1949_v41 }
 0x235   :  { %v1887_v12 = vmax.f32 %v1839_v3, 0.0  ;;  %v1954_v54 = vmul.f32 %v3252_v55, %v1889_v52  ;;  %v1842_v44 = vadd.f32 %v3255_v45, %v1769_v1  ;;  %v2337_v11 = vpop.f32.mrb[108].mxu1  ;;  %v1573_v32 = vpop.f32.mrb[44].mxu0  ;;  %v2006_v51 = vadd.f32 %v1951_v42, %v1950_v50 }
 0x236   :  { %2004 = vadd.xlane.f32.xlu1 %v2003_v47  ;;  %v1843_v2 = vadd.f32 %v3235_v35, %v1573_v32  ;;  %v1575_v18 = vpop.f32.mrb[45].mxu0  ;;  %v2338_v56 = vpop.f32.mrb[109].mxu1 }
 0x237   :  { %v1890_v6 = vmax.f32 %v1842_v44, 0.0  ;;  %v1844_v38 = vadd.f32 %v3244_v9, %v1575_v18  ;;  %v2339_v24 = vadd.f32 %v2338_v56, %v2337_v11  ;;  %v1577_v29 = vpop.f32.mrb[46].mxu0  ;;  %v2340_v17 = vpop.f32.mrb[110].mxu1  ;;  %v1952_v58 = vmul.f32 %v3262_v60, %v1887_v12 }
 0x238   :  { %v1891_v5 = vmax.f32 %v1843_v2, 0.0  ;;  %v1846_v25 = vadd.f32 %v3235_v35, %v1577_v29  ;;  %v1579_v53 = vpop.f32.mrb[47].mxu0  ;;  %v2341_v40 = vpop.f32.mrb[111].mxu1  ;;  %v2010_v15 = vadd.f32 %v1954_v54, %v1953_v22 }
 0x239   :  { %v1892_v63 = vmax.f32 %v1844_v38, 0.0  ;;  %v1774_v30 = vadd.f32 %v2339_v24, %v3217_v7  ;;  %v1847_v14 = vadd.f32 %v3244_v9, %v1579_v53  ;;  %v2342_v27 = vadd.f32 %v2341_v40, %v2340_v17 }
 0x23a   :  { %v1956_v46 = vmul.f32 %v3248_v21, %v1891_v5  ;;  %v1894_v48 = vmax.f32 %v1846_v25, 0.0  ;;  %v2007_v4 = vadd.f32 %v2006_v51, %v1952_v58  ;;  %v1955_v61 = vmul.f32 %v3262_v60, %v1890_v6 }
 0x23b   :  { %v1957_v10 = vmul.f32 %v3252_v55, %v1892_v63  ;;  %v1845_v57 = vadd.f32 %v3255_v45, %v1774_v30  ;;  %v1895_v16 = vmax.f32 %v1847_v14, 0.0  ;;  %v1777_v31 = vadd.f32 %v2342_v27, %v3220_v19 }
 0x23c   :  { %v1959_v13 = vmul.f32 %v3248_v21, %v1894_v48  ;;  %2008 = vadd.xlane.f32.xlu0 %v2007_v4  ;;  %v2011_v7 = vadd.f32 %v2010_v15, %v1955_v61 }
 0x23d   :  { %v1893_v36 = vmax.f32 %v1845_v57, 0.0  ;;  %v1960_v28 = vmul.f32 %v3252_v55, %v1895_v16  ;;  %v1848_v0 = vadd.f32 %v3255_v45, %v1777_v31  ;;  %v2343_v23 = vpop.f32.mrb[112].mxu1  ;;  %v1583_v33 = vpop.f32.mrb[48].mxu0  ;;  %v2014_v43 = vadd.f32 %v1957_v10, %v1956_v46 }
 0x23e   :  { %2012 = vadd.xlane.f32.xlu1 %v2011_v7  ;;  %v1849_v26 = vadd.f32 %v3235_v35, %v1583_v33  ;;  %v1585_v34 = vpop.f32.mrb[49].mxu0  ;;  %v2344_v37 = vpop.f32.mrb[113].mxu1 }
 0x23f   :  { %v1896_v50 = vmax.f32 %v1848_v0, 0.0  ;;  %v1850_v19 = vadd.f32 %v3244_v9, %v1585_v34  ;;  %v2345_v62 = vadd.f32 %v2344_v37, %v2343_v23  ;;  %v1587_v39 = vpop.f32.mrb[50].mxu0  ;;  %v2346_v41 = vpop.f32.mrb[114].mxu1  ;;  %v1958_v42 = vmul.f32 %v3262_v60, %v1893_v36 }
 0x240   :  { %v1897_v3 = vmax.f32 %v1849_v26, 0.0  ;;  %v1852_v52 = vadd.f32 %v3235_v35, %v1587_v39  ;;  %v1589_v1 = vpop.f32.mrb[51].mxu0  ;;  %v2347_v22 = vpop.f32.mrb[115].mxu1  ;;  %v2018_v47 = vadd.f32 %v1960_v28, %v1959_v13 }
 0x241   :  { %v1898_v12 = vmax.f32 %v1850_v19, 0.0  ;;  %v1782_v54 = vadd.f32 %v2345_v62, %v3223_v59  ;;  %v1853_v44 = vadd.f32 %v3244_v9, %v1589_v1  ;;  %v2348_v11 = vadd.f32 %v2347_v22, %v2346_v41 }
 0x242   :  { %v1962_v32 = vmul.f32 %v3248_v21, %v1897_v3  ;;  %v1900_v51 = vmax.f32 %v1852_v52, 0.0  ;;  %v2015_v2 = vadd.f32 %v2014_v43, %v1958_v42  ;;  %v1961_v18 = vmul.f32 %v3262_v60, %v1896_v50 }
 0x243   :  { %v1963_v56 = vmul.f32 %v3252_v55, %v1898_v12  ;;  %v1851_v6 = vadd.f32 %v3255_v45, %v1782_v54  ;;  %v1901_v38 = vmax.f32 %v1853_v44, 0.0  ;;  %v1785_v24 = vadd.f32 %v2348_v11, %v3226_v49 }
 0x244   :  { %v1965_v29 = vmul.f32 %v3248_v21, %v1900_v51  ;;  %2016 = vadd.xlane.f32.xlu0 %v2015_v2  ;;  %v2019_v59 = vadd.f32 %v2018_v47, %v1961_v18 }
 0x245   :  { %v1899_v17 = vmax.f32 %v1851_v6, 0.0  ;;  %v1966_v58 = vmul.f32 %v3252_v55, %v1901_v38  ;;  %v1854_v5 = vadd.f32 %v3255_v45, %v1785_v24  ;;  %v2349_v25 = vpop.f32.mrb[116].mxu1  ;;  %v1593_v53 = vpop.f32.mrb[52].mxu0  ;;  %v2022_v40 = vadd.f32 %v1963_v56, %v1962_v32 }
 0x246   :  { %2020 = vadd.xlane.f32.xlu1 %v2019_v59  ;;  %v1855_v15 = vadd.f32 %v3235_v35, %v1593_v53  ;;  %v1595_v63 = vpop.f32.mrb[53].mxu0  ;;  %v2350_v30 = vpop.f32.mrb[117].mxu1 }
 0x247   :  { %v1902_v14 = vmax.f32 %v1854_v5, 0.0  ;;  %v1856_v49 = vadd.f32 %v3244_v9, %v1595_v63  ;;  %v2351_v27 = vadd.f32 %v2350_v30, %v2349_v25  ;;  %v1597_v46 = vpop.f32.mrb[54].mxu0  ;;  %v2352_v48 = vpop.f32.mrb[118].mxu1  ;;  %v1964_v4 = vmul.f32 %v3262_v60, %v1899_v17 }
 0x248   :  { %v1903_v61 = vmax.f32 %v1855_v15, 0.0  ;;  %v1858_v10 = vadd.f32 %v3235_v35, %v1597_v46  ;;  %v1599_v57 = vpop.f32.mrb[55].mxu0  ;;  %v2353_v16 = vpop.f32.mrb[119].mxu1  ;;  %v2026_v31 = vadd.f32 %v1966_v58, %v1965_v29 }
 0x249   :  { %v1904_v13 = vmax.f32 %v1856_v49, 0.0  ;;  %v1790_v7 = vadd.f32 %v2351_v27, %v3232_v8  ;;  %v1859_v36 = vadd.f32 %v3244_v9, %v1599_v57  ;;  %v2354_v28 = vadd.f32 %v2353_v16, %v2352_v48 }
 0x24a   :  { %v1968_v0 = vmul.f32 %v3248_v21, %v1903_v61  ;;  %v1906_v23 = vmax.f32 %v1858_v10, 0.0  ;;  %v2023_v33 = vadd.f32 %v2022_v40, %v1964_v4  ;;  %v1967_v43 = vmul.f32 %v3262_v60, %v1902_v14 }
 0x24b   :  { %v1969_v26 = vmul.f32 %v3252_v55, %v1904_v13  ;;  %v1857_v34 = vadd.f32 %v3255_v45, %v1790_v7  ;;  %v1907_v35 = vmax.f32 %v1859_v36, 0.0  ;;  %v1793_v37 = vadd.f32 %v2354_v28, %v3238_v20 }
 0x24c   :  { %v1971_v50 = vmul.f32 %v3248_v21, %v1906_v23  ;;  %2024 = vadd.xlane.f32.xlu0 %v2023_v33  ;;  %v2027_v8 = vadd.f32 %v2026_v31, %v1967_v43  ;;  %v2039_v21 = vstv %s3445_s8 }
 0x24d   :  { %v1905_v19 = vmax.f32 %v1857_v34, 0.0  ;;  %v1972_v9 = vmul.f32 %v3252_v55, %v1907_v35  ;;  %v1860_v62 = vadd.f32 %v3255_v45, %v1793_v37  ;;  %v2030_v39 = vadd.f32 %v1969_v26, %v1968_v0 }
 0x24e   :  { %2028 = vadd.xlane.f32.xlu1 %v2027_v8 }
 0x24f   :  { %v1908_v41 = vmax.f32 %v1860_v62, 0.0  ;;  %v1970_v42 = vmul.f32 %v3262_v60, %v1905_v19  ;;  %v2034_v3 = vadd.f32 %v1972_v9, %v1971_v50 }
 0x251   :  { %v2031_v52 = vadd.f32 %v2030_v39, %v1970_v42  ;;  %v1973_v1 = vmul.f32 %v3262_v60, %v1908_v41 }
 0x253   :  { %2032 = vadd.xlane.f32.xlu0 %v2031_v52  ;;  %v2035_v20 = vadd.f32 %v2034_v3, %v1973_v1 }
 0x255   :  { %2036 = vadd.xlane.f32.xlu1 %v2035_v20 }
 0x2a9   :  { %v1977_v55 = vpop.xlane.xlu0 %1976 }
 0x2aa   :  { %v2040_v22 = vadd.f32 %v2039_v21, %v1977_v55 }
 0x2ac   :  { %2057 = vst.msk [vmem:[%s3446_s9] sm:$0xff] %vm2056_vm3, %v2040_v22 }
 0x2ad   :  { %v1981_v45 = vpop.xlane.xlu0 %1980 }
 0x2ae   :  { %v2041_v47 = vadd.f32 %v2039_v21, %v1981_v45 }
 0x2b0   :  { %2058 = vst.msk [vmem:[%s3446_s9 + $0x8] sm:$0xff] %vm2056_vm3, %v2041_v47 }
 0x2b1   :  { %v1985_v60 = vpop.xlane.xlu1 %1984 }
 0x2b2   :  { %v2042_v12 = vadd.f32 %v2039_v21, %v1985_v60 }
 0x2b4   :  { %2059 = vst.msk [vmem:[%s3446_s9 + $0x10] sm:$0xff] %vm2056_vm3, %v2042_v12 }
 0x2b5   :  { %v1989_v54 = vpop.xlane.xlu1 %1988 }
 0x2b6   :  { %v2043_v44 = vadd.f32 %v2039_v21, %v1989_v54 }
 0x2b8   :  { %2060 = vst.msk [vmem:[%s3446_s9 + $0x18] sm:$0xff] %vm2056_vm3, %v2043_v44 }
 0x2b9   :  { %v1993_v11 = vpop.xlane.xlu0 %1992 }
 0x2ba   :  { %v2044_v32 = vadd.f32 %v2039_v21, %v1993_v11 }
 0x2bb   :  { %v1997_v51 = vpop.xlane.xlu1 %1996 }
 0x2bc   :  { %2061 = vst.msk [vmem:[%s3446_s9 + $0x20] sm:$0xff] %vm2056_vm3, %v2044_v32  ;;  %v2045_v2 = vadd.f32 %v2039_v21, %v1997_v51 }
 0x2be   :  { %2062 = vst.msk [vmem:[%s3446_s9 + $0x28] sm:$0xff] %vm2056_vm3, %v2045_v2 }
 0x2c1   :  { %v2001_v18 = vpop.xlane.xlu0 %2000 }
 0x2c2   :  { %v2046_v56 = vadd.f32 %v2039_v21, %v2001_v18 }
 0x2c3   :  { %v2005_v6 = vpop.xlane.xlu1 %2004 }
 0x2c4   :  { %2063 = vst.msk [vmem:[%s3446_s9 + $0x30] sm:$0xff] %vm2056_vm3, %v2046_v56  ;;  %v2047_v38 = vadd.f32 %v2039_v21, %v2005_v6 }
 0x2c6   :  { %2064 = vst.msk [vmem:[%s3446_s9 + $0x38] sm:$0xff] %vm2056_vm3, %v2047_v38 }
 0x2c9   :  { %v2009_v24 = vpop.xlane.xlu0 %2008 }
 0x2ca   :  { %v2048_v29 = vadd.f32 %v2039_v21, %v2009_v24 }
 0x2cb   :  { %v2013_v59 = vpop.xlane.xlu1 %2012 }
 0x2cc   :  { %2065 = vst.msk [vmem:[%s3446_s9 + $0x40] sm:$0xff] %vm2056_vm3, %v2048_v29  ;;  %v2049_v17 = vadd.f32 %v2039_v21, %v2013_v59 }
 0x2ce   :  { %2066 = vst.msk [vmem:[%s3446_s9 + $0x48] sm:$0xff] %vm2056_vm3, %v2049_v17 }
 0x2d1   :  { %v2017_v58 = vpop.xlane.xlu0 %2016 }
 0x2d2   :  { %v2050_v5 = vadd.f32 %v2039_v21, %v2017_v58 }
 0x2d3   :  { %v2021_v25 = vpop.xlane.xlu1 %2020 }
 0x2d4   :  { %2067 = vst.msk [vmem:[%s3446_s9 + $0x50] sm:$0xff] %vm2056_vm3, %v2050_v5  ;;  %v2051_v53 = vadd.f32 %v2039_v21, %v2021_v25 }
 0x2d6   :  { %2068 = vst.msk [vmem:[%s3446_s9 + $0x58] sm:$0xff] %vm2056_vm3, %v2051_v53 }
 0x2d9   :  { %v2025_v40 = vpop.xlane.xlu0 %2024 }
 0x2da   :  { %v2052_v15 = vadd.f32 %v2039_v21, %v2025_v40 }
 0x2db   :  { %v2029_v63 = vpop.xlane.xlu1 %2028 }
 0x2dc   :  { %2069 = vst.msk [vmem:[%s3446_s9 + $0x60] sm:$0xff] %vm2056_vm3, %v2052_v15  ;;  %v2053_v30 = vadd.f32 %v2039_v21, %v2029_v63 }
 0x2de   :  { %2070 = vst.msk [vmem:[%s3446_s9 + $0x68] sm:$0xff] %vm2056_vm3, %v2053_v30 }
 0x2e0   :  { %v2033_v14 = vpop.xlane.xlu0 %2032 }
 0x2e1   :  { %v2054_v49 = vadd.f32 %v2039_v21, %v2033_v14 }
 0x2e2   :  { %v2037_v27 = vpop.xlane.xlu1 %2036 }
 0x2e3   :  { %2071 = vst.msk [vmem:[%s3446_s9 + $0x70] sm:$0xff] %vm2056_vm3, %v2054_v49  ;;  %v2055_v46 = vadd.f32 %v2039_v21, %v2037_v27 }
 0x2e5   :  { %2072 = vst.msk [vmem:[%s3446_s9 + $0x78] sm:$0xff] %vm2056_vm3, %v2055_v46 }
 0x2e6   :  { %2077 = vsyncpa [#allocation4], 1 }

</bundles_post_ra>
